<compile_context>
chip_gen: v6e
topology: v6e:2x2x1
jax: 0.10.0
libtpu: 0.0.40
codegen_flags: <defaults>
</compile_context>

<pallas_src>
import jax
import jax.numpy as jnp
from jax.experimental import pallas as pl
from jax.experimental.pallas import tpu as pltpu

EMBED_DIM = 768
LAYER_DIMS = [(EMBED_DIM, 384), (384, 512), (512, 256), (256, 384), (384, 128)]
OUT_DIM = LAYER_DIMS[-1][1]
_MAX_TILE = 512   # rows of EACH input per grid step (=> 2*TB rows per matmul)
_SUBLANE = 16     # bf16-friendly sublane granularity


def _round_up(x, m):
    return (x + m - 1) // m * m


def _siamese_mlp_kernel(x1_ref, x2_ref,
                        w1, b1, w2, b2, w3, b3, w4, b4, w5, b5,
                        o1_ref, o2_ref):
    """Shared 5-layer MLP applied to both Siamese inputs in one pass.

    Linear weights are stored (in, out) so y = x @ W + b == torch Linear.
    ReLU after layers 1-4 only; layer 5 is linear.
    """
    tb = x1_ref.shape[0]
    # Cast each branch tile to bf16, then fuse along the sublane axis so every
    # matmul sees M = 2*TB rows (VMEM-local copy, half width vs f32 concat).
    h = jnp.concatenate([x1_ref[...].astype(jnp.bfloat16),
                         x2_ref[...].astype(jnp.bfloat16)], axis=0)

    def dense(h_bf16, w_ref, b_ref, relu):
        # bf16 x bf16 matmul on the MXU, f32 accumulation.
        acc = jnp.dot(h_bf16, w_ref[...], preferred_element_type=jnp.float32)
        acc = acc + b_ref[...]           # f32 bias add (VPU)
        if relu:
            acc = jnp.maximum(acc, 0.0)  # f32 ReLU (VPU)
        return acc

    h = dense(h, w1, b1, True).astype(jnp.bfloat16)
    h = dense(h, w2, b2, True).astype(jnp.bfloat16)
    h = dense(h, w3, b3, True).astype(jnp.bfloat16)
    h = dense(h, w4, b4, True).astype(jnp.bfloat16)
    out = dense(h, w5, b5, False)        # final layer: no activation, f32 out

    o1_ref[...] = out[:tb].astype(o1_ref.dtype)
    o2_ref[...] = out[tb:].astype(o2_ref.dtype)


@jax.jit
def siamese_forward(input1, input2, params):
    """Equivalent of SiameseContrastiveModel.forward(input1, input2)."""
    b = input1.shape[0]
    # Tile size: at most _MAX_TILE rows per input per step, at least 16 sublanes.
    tb = min(_MAX_TILE, _round_up(b, _SUBLANE))
    padded_b = _round_up(b, tb)
    pad = padded_b - b
    x1 = jnp.pad(input1, ((0, pad), (0, 0))) if pad else input1
    x2 = jnp.pad(input2, ((0, pad), (0, 0))) if pad else input2

    flat = []
    param_specs = []
    for w, b_vec in params:
        # Weights in bf16 (halves the dominant weight DMA, native MXU dtype),
        # fetched once (constant index_map) and resident across the batch grid.
        flat.append(w.astype(jnp.bfloat16))
        param_specs.append(pl.BlockSpec(w.shape, lambda i: (0, 0)))
        # Biases as (1, N) f32, broadcast over batch rows inside the kernel.
        flat.append(b_vec.reshape(1, -1).astype(jnp.float32))
        param_specs.append(pl.BlockSpec((1, b_vec.shape[0]), lambda i: (0, 0)))

    n_tiles = padded_b // tb
    x_spec = pl.BlockSpec((tb, EMBED_DIM), lambda i: (i, 0))
    o_spec = pl.BlockSpec((tb, OUT_DIM), lambda i: (i, 0))

    out1, out2 = pl.pallas_call(
        _siamese_mlp_kernel,
        out_shape=(jax.ShapeDtypeStruct((padded_b, OUT_DIM), jnp.float32),
                   jax.ShapeDtypeStruct((padded_b, OUT_DIM), jnp.float32)),
        grid=(n_tiles,),
        in_specs=[x_spec, x_spec] + param_specs,
        out_specs=(o_spec, o_spec),
        compiler_params=pltpu.CompilerParams(
            dimension_semantics=("parallel",),     # megacore sharding on v7x
            vmem_limit_bytes=32 * 1024 * 1024),    # safe on v5e/v6e/v7x budgets
    )(x1, x2, *flat)

    return out1[:b], out2[:b]


def init_params(key):
    """Deterministic init mimicking nn.Linear defaults: U(-1/sqrt(fan_in), +)."""
    params = []
    for (fan_in, fan_out) in LAYER_DIMS:
        key, kw, kb = jax.random.split(key, 3)
        bound = 1.0 / jnp.sqrt(fan_in)
        w = jax.random.uniform(kw, (fan_in, fan_out), jnp.float32, -bound, bound)
        b = jax.random.uniform(kb, (fan_out,), jnp.float32, -bound, bound)
        params.append((w, b))
    return params


def _reference_forward(x, params):
    """Pure-JAX reference with the same bf16-matmul / f32-accumulate recipe."""
    h = x
    for i, (w, b) in enumerate(params):
        acc = jnp.dot(h.astype(jnp.bfloat16), w.astype(jnp.bfloat16),
                      preferred_element_type=jnp.float32) + b
        if i < len(params) - 1:
            acc = jnp.maximum(acc, 0.0)
        h = acc
    return h


# TODO(synk): fit()/predict() (Adam training loop, contrastive loss, cosine
# similarity thresholding, pandas handling) are host-side training utilities,
# not part of the forward pass, and are not translated to Pallas.


if __name__ == "__main__":
    key = jax.random.PRNGKey(0)
    key, k1, k2 = jax.random.split(key, 3)

    batch = 2
    input1 = jax.random.normal(k1, (batch, EMBED_DIM), jnp.float32)
    input2 = jax.random.normal(k2, (batch, EMBED_DIM), jnp.float32)

    params = init_params(key)

    out1, out2 = siamese_forward(input1, input2, params)
    out1 = jax.block_until_ready(out1)
    out2 = jax.block_until_ready(out2)

    ref1 = _reference_forward(input1, params)
    ref2 = _reference_forward(input2, params)
    assert out1.shape == (batch, OUT_DIM) and out2.shape == (batch, OUT_DIM)
    assert jnp.allclose(out1, ref1, atol=1e-2, rtol=1e-2)
    assert jnp.allclose(out2, ref2, atol=1e-2, rtol=1e-2)

    print("KERNEL_OK")
</pallas_src>

<mosaic_0001>
module attributes {stable_mosaic.version = 11 : i64} {
  func.func @_siamese_mlp_kernel(%arg0: i32, %arg1: memref<16x768xf32, #tpu.memory_space<vmem>>, %arg2: memref<16x768xf32, #tpu.memory_space<vmem>>, %arg3: memref<768x384xbf16, #tpu.memory_space<vmem>>, %arg4: memref<1x384xf32, #tpu.memory_space<vmem>>, %arg5: memref<384x512xbf16, #tpu.memory_space<vmem>>, %arg6: memref<1x512xf32, #tpu.memory_space<vmem>>, %arg7: memref<512x256xbf16, #tpu.memory_space<vmem>>, %arg8: memref<1x256xf32, #tpu.memory_space<vmem>>, %arg9: memref<256x384xbf16, #tpu.memory_space<vmem>>, %arg10: memref<1x384xf32, #tpu.memory_space<vmem>>, %arg11: memref<384x128xbf16, #tpu.memory_space<vmem>>, %arg12: memref<1x128xf32, #tpu.memory_space<vmem>>, %arg13: memref<16x128xf32, #tpu.memory_space<vmem>>, %arg14: memref<16x128xf32, #tpu.memory_space<vmem>>) attributes {dimension_semantics = [#tpu.dimension_semantics<parallel>], iteration_bounds = array<i64: 1>, scalar_prefetch = 0 : i64, scratch_operands = 0 : i64, tpu.core_type = #tpu.core_type<tc>, window_params = [{transform_indices = @transform_0, window_bounds = array<i64: 16, 768>}, {transform_indices = @transform_1, window_bounds = array<i64: 16, 768>}, {pipeline_mode = #tpu.pipeline_mode<synchronous>, transform_indices = @transform_2, window_bounds = array<i64: 768, 384>}, {pipeline_mode = #tpu.pipeline_mode<synchronous>, transform_indices = @transform_3, window_bounds = array<i64: 1, 384>}, {pipeline_mode = #tpu.pipeline_mode<synchronous>, transform_indices = @transform_4, window_bounds = array<i64: 384, 512>}, {pipeline_mode = #tpu.pipeline_mode<synchronous>, transform_indices = @transform_5, window_bounds = array<i64: 1, 512>}, {pipeline_mode = #tpu.pipeline_mode<synchronous>, transform_indices = @transform_6, window_bounds = array<i64: 512, 256>}, {pipeline_mode = #tpu.pipeline_mode<synchronous>, transform_indices = @transform_7, window_bounds = array<i64: 1, 256>}, {pipeline_mode = #tpu.pipeline_mode<synchronous>, transform_indices = @transform_8, window_bounds = array<i64: 256, 384>}, {pipeline_mode = #tpu.pipeline_mode<synchronous>, transform_indices = @transform_9, window_bounds = array<i64: 1, 384>}, {pipeline_mode = #tpu.pipeline_mode<synchronous>, transform_indices = @transform_10, window_bounds = array<i64: 384, 128>}, {pipeline_mode = #tpu.pipeline_mode<synchronous>, transform_indices = @transform_11, window_bounds = array<i64: 1, 128>}, {transform_indices = @transform_12, window_bounds = array<i64: 16, 128>}, {transform_indices = @transform_13, window_bounds = array<i64: 16, 128>}]} {
    %c0 = arith.constant 0 : index
    %c0_0 = arith.constant 0 : index
    %0 = vector.load %arg1[%c0, %c0_0] : memref<16x768xf32, #tpu.memory_space<vmem>>, vector<16x768xf32>
    %1 = arith.truncf %0 : vector<16x768xf32> to vector<16x768xbf16>
    %c0_1 = arith.constant 0 : index
    %c0_2 = arith.constant 0 : index
    %2 = vector.load %arg2[%c0_1, %c0_2] : memref<16x768xf32, #tpu.memory_space<vmem>>, vector<16x768xf32>
    %3 = arith.truncf %2 : vector<16x768xf32> to vector<16x768xbf16>
    %4 = tpu.concatenate %1, %3 in 0 : vector<16x768xbf16>, vector<16x768xbf16> -> vector<32x768xbf16>
    %c0_3 = arith.constant 0 : index
    %c0_4 = arith.constant 0 : index
    %5 = vector.load %arg3[%c0_3, %c0_4] : memref<768x384xbf16, #tpu.memory_space<vmem>>, vector<768x384xbf16>
    %cst = arith.constant dense<0.000000e+00> : vector<32x384xf32>
    %6 = tpu.matmul %4, %5, %cst {dimension_numbers = #tpu.dot_dimension_numbers<[1], [0], [0], [1], [0, 0, 1, 1], [], []>} : vector<32x768xbf16>, vector<768x384xbf16>, vector<32x384xf32> -> vector<32x384xf32>
    %c0_5 = arith.constant 0 : index
    %c0_6 = arith.constant 0 : index
    %7 = vector.load %arg4[%c0_5, %c0_6] : memref<1x384xf32, #tpu.memory_space<vmem>>, vector<1x384xf32>
    %8 = vector.broadcast %7 : vector<1x384xf32> to vector<32x384xf32>
    %9 = arith.addf %6, %8 : vector<32x384xf32>
    %cst_7 = arith.constant 0.000000e+00 : f32
    %10 = vector.broadcast %cst_7 : f32 to vector<32x384xf32>
    %11 = arith.maximumf %9, %10 : vector<32x384xf32>
    %12 = arith.truncf %11 : vector<32x384xf32> to vector<32x384xbf16>
    %c0_8 = arith.constant 0 : index
    %c0_9 = arith.constant 0 : index
    %13 = vector.load %arg5[%c0_8, %c0_9] : memref<384x512xbf16, #tpu.memory_space<vmem>>, vector<384x512xbf16>
    %cst_10 = arith.constant dense<0.000000e+00> : vector<32x512xf32>
    %14 = tpu.matmul %12, %13, %cst_10 {dimension_numbers = #tpu.dot_dimension_numbers<[1], [0], [0], [1], [0, 0, 1, 1], [], []>} : vector<32x384xbf16>, vector<384x512xbf16>, vector<32x512xf32> -> vector<32x512xf32>
    %c0_11 = arith.constant 0 : index
    %c0_12 = arith.constant 0 : index
    %15 = vector.load %arg6[%c0_11, %c0_12] : memref<1x512xf32, #tpu.memory_space<vmem>>, vector<1x512xf32>
    %16 = vector.broadcast %15 : vector<1x512xf32> to vector<32x512xf32>
    %17 = arith.addf %14, %16 : vector<32x512xf32>
    %cst_13 = arith.constant 0.000000e+00 : f32
    %18 = vector.broadcast %cst_13 : f32 to vector<32x512xf32>
    %19 = arith.maximumf %17, %18 : vector<32x512xf32>
    %20 = arith.truncf %19 : vector<32x512xf32> to vector<32x512xbf16>
    %c0_14 = arith.constant 0 : index
    %c0_15 = arith.constant 0 : index
    %21 = vector.load %arg7[%c0_14, %c0_15] : memref<512x256xbf16, #tpu.memory_space<vmem>>, vector<512x256xbf16>
    %cst_16 = arith.constant dense<0.000000e+00> : vector<32x256xf32>
    %22 = tpu.matmul %20, %21, %cst_16 {dimension_numbers = #tpu.dot_dimension_numbers<[1], [0], [0], [1], [0, 0, 1, 1], [], []>} : vector<32x512xbf16>, vector<512x256xbf16>, vector<32x256xf32> -> vector<32x256xf32>
    %c0_17 = arith.constant 0 : index
    %c0_18 = arith.constant 0 : index
    %23 = vector.load %arg8[%c0_17, %c0_18] : memref<1x256xf32, #tpu.memory_space<vmem>>, vector<1x256xf32>
    %24 = vector.broadcast %23 : vector<1x256xf32> to vector<32x256xf32>
    %25 = arith.addf %22, %24 : vector<32x256xf32>
    %cst_19 = arith.constant 0.000000e+00 : f32
    %26 = vector.broadcast %cst_19 : f32 to vector<32x256xf32>
    %27 = arith.maximumf %25, %26 : vector<32x256xf32>
    %28 = arith.truncf %27 : vector<32x256xf32> to vector<32x256xbf16>
    %c0_20 = arith.constant 0 : index
    %c0_21 = arith.constant 0 : index
    %29 = vector.load %arg9[%c0_20, %c0_21] : memref<256x384xbf16, #tpu.memory_space<vmem>>, vector<256x384xbf16>
    %cst_22 = arith.constant dense<0.000000e+00> : vector<32x384xf32>
    %30 = tpu.matmul %28, %29, %cst_22 {dimension_numbers = #tpu.dot_dimension_numbers<[1], [0], [0], [1], [0, 0, 1, 1], [], []>} : vector<32x256xbf16>, vector<256x384xbf16>, vector<32x384xf32> -> vector<32x384xf32>
    %c0_23 = arith.constant 0 : index
    %c0_24 = arith.constant 0 : index
    %31 = vector.load %arg10[%c0_23, %c0_24] : memref<1x384xf32, #tpu.memory_space<vmem>>, vector<1x384xf32>
    %32 = vector.broadcast %31 : vector<1x384xf32> to vector<32x384xf32>
    %33 = arith.addf %30, %32 : vector<32x384xf32>
    %cst_25 = arith.constant 0.000000e+00 : f32
    %34 = vector.broadcast %cst_25 : f32 to vector<32x384xf32>
    %35 = arith.maximumf %33, %34 : vector<32x384xf32>
    %36 = arith.truncf %35 : vector<32x384xf32> to vector<32x384xbf16>
    %c0_26 = arith.constant 0 : index
    %c0_27 = arith.constant 0 : index
    %37 = vector.load %arg11[%c0_26, %c0_27] : memref<384x128xbf16, #tpu.memory_space<vmem>>, vector<384x128xbf16>
    %cst_28 = arith.constant dense<0.000000e+00> : vector<32x128xf32>
    %38 = tpu.matmul %36, %37, %cst_28 {dimension_numbers = #tpu.dot_dimension_numbers<[1], [0], [0], [1], [0, 0, 1, 1], [], []>} : vector<32x384xbf16>, vector<384x128xbf16>, vector<32x128xf32> -> vector<32x128xf32>
    %c0_29 = arith.constant 0 : index
    %c0_30 = arith.constant 0 : index
    %39 = vector.load %arg12[%c0_29, %c0_30] : memref<1x128xf32, #tpu.memory_space<vmem>>, vector<1x128xf32>
    %40 = vector.broadcast %39 : vector<1x128xf32> to vector<32x128xf32>
    %41 = arith.addf %38, %40 : vector<32x128xf32>
    %42 = vector.extract_strided_slice %41 {offsets = [0, 0], sizes = [16, 128], strides = [1, 1]} : vector<32x128xf32> to vector<16x128xf32>
    %c0_31 = arith.constant 0 : index
    %c0_32 = arith.constant 0 : index
    %43 = vector.load %arg13[%c0_31, %c0_32] : memref<16x128xf32, #tpu.memory_space<vmem>>, vector<16x128xf32>
    tpu.vector_store %arg13[%c0_31, %c0_32], %42 {strides = array<i32>} : memref<16x128xf32, #tpu.memory_space<vmem>>, vector<16x128xf32>,
    %44 = vector.extract_strided_slice %41 {offsets = [16, 0], sizes = [16, 128], strides = [1, 1]} : vector<32x128xf32> to vector<16x128xf32>
    %c0_33 = arith.constant 0 : index
    %c0_34 = arith.constant 0 : index
    %45 = vector.load %arg14[%c0_33, %c0_34] : memref<16x128xf32, #tpu.memory_space<vmem>>, vector<16x128xf32>
    tpu.vector_store %arg14[%c0_33, %c0_34], %44 {strides = array<i32>} : memref<16x128xf32, #tpu.memory_space<vmem>>, vector<16x128xf32>,
    return
  }
  func.func @transform_0(%arg0: i32) -> (i32, i32) {
    %c0_i32 = arith.constant 0 : i32
    %c0_i32_0 = arith.constant 0 : i32
    return %arg0, %c0_i32 : i32, i32
  }
  func.func @transform_1(%arg0: i32) -> (i32, i32) {
    %c0_i32 = arith.constant 0 : i32
    %c0_i32_0 = arith.constant 0 : i32
    return %arg0, %c0_i32 : i32, i32
  }
  func.func @transform_2(%arg0: i32) -> (i32, i32) {
    %c0_i32 = arith.constant 0 : i32
    %c0_i32_0 = arith.constant 0 : i32
    %c0_i32_1 = arith.constant 0 : i32
    return %c0_i32, %c0_i32_0 : i32, i32
  }
  func.func @transform_3(%arg0: i32) -> (i32, i32) {
    %c0_i32 = arith.constant 0 : i32
    %c0_i32_0 = arith.constant 0 : i32
    %c0_i32_1 = arith.constant 0 : i32
    return %c0_i32, %c0_i32_0 : i32, i32
  }
  func.func @transform_4(%arg0: i32) -> (i32, i32) {
    %c0_i32 = arith.constant 0 : i32
    %c0_i32_0 = arith.constant 0 : i32
    %c0_i32_1 = arith.constant 0 : i32
    return %c0_i32, %c0_i32_0 : i32, i32
  }
  func.func @transform_5(%arg0: i32) -> (i32, i32) {
    %c0_i32 = arith.constant 0 : i32
    %c0_i32_0 = arith.constant 0 : i32
    %c0_i32_1 = arith.constant 0 : i32
    return %c0_i32, %c0_i32_0 : i32, i32
  }
  func.func @transform_6(%arg0: i32) -> (i32, i32) {
    %c0_i32 = arith.constant 0 : i32
    %c0_i32_0 = arith.constant 0 : i32
    %c0_i32_1 = arith.constant 0 : i32
    return %c0_i32, %c0_i32_0 : i32, i32
  }
  func.func @transform_7(%arg0: i32) -> (i32, i32) {
    %c0_i32 = arith.constant 0 : i32
    %c0_i32_0 = arith.constant 0 : i32
    %c0_i32_1 = arith.constant 0 : i32
    return %c0_i32, %c0_i32_0 : i32, i32
  }
  func.func @transform_8(%arg0: i32) -> (i32, i32) {
    %c0_i32 = arith.constant 0 : i32
    %c0_i32_0 = arith.constant 0 : i32
    %c0_i32_1 = arith.constant 0 : i32
    return %c0_i32, %c0_i32_0 : i32, i32
  }
  func.func @transform_9(%arg0: i32) -> (i32, i32) {
    %c0_i32 = arith.constant 0 : i32
    %c0_i32_0 = arith.constant 0 : i32
    %c0_i32_1 = arith.constant 0 : i32
    return %c0_i32, %c0_i32_0 : i32, i32
  }
  func.func @transform_10(%arg0: i32) -> (i32, i32) {
    %c0_i32 = arith.constant 0 : i32
    %c0_i32_0 = arith.constant 0 : i32
    %c0_i32_1 = arith.constant 0 : i32
    return %c0_i32, %c0_i32_0 : i32, i32
  }
  func.func @transform_11(%arg0: i32) -> (i32, i32) {
    %c0_i32 = arith.constant 0 : i32
    %c0_i32_0 = arith.constant 0 : i32
    %c0_i32_1 = arith.constant 0 : i32
    return %c0_i32, %c0_i32_0 : i32, i32
  }
  func.func @transform_12(%arg0: i32) -> (i32, i32) {
    %c0_i32 = arith.constant 0 : i32
    %c0_i32_0 = arith.constant 0 : i32
    return %arg0, %c0_i32 : i32, i32
  }
  func.func @transform_13(%arg0: i32) -> (i32, i32) {
    %c0_i32 = arith.constant 0 : i32
    %c0_i32_0 = arith.constant 0 : i32
    return %arg0, %c0_i32 : i32, i32
  }
}

</mosaic_0001>

<bundles_post_ra>
// kernel: siamese_forward.1
= control target key start
LH: loop header
LB: loop body
LE: loop exit
PB: predicated region body
PF: predicated region fallthrough
CT: control target
= control target key end

     0   :  { %s5969_s2 = inlined_call_operand.vmem [shape: bf16[768,384], index: 2, kind: input, shape index: {}]   ;;  %s5970_s0 = inlined_call_operand.vmem [shape: f32[16,768], index: 0, kind: input, shape index: {}]   ;;  %s5971_s1 = inlined_call_operand.vmem [shape: f32[16,768], index: 1, kind: input, shape index: {}]   ;;  %s5972_s4 = inlined_call_operand.vmem [shape: bf16[384,512], index: 4, kind: input, shape index: {}]   ;;  %s5973_s3 = inlined_call_operand.vmem [shape: f32[1,384], index: 3, kind: input, shape index: {}]   ;;  %s5974_s6 = inlined_call_operand.vmem [shape: bf16[512,256], index: 6, kind: input, shape index: {}]   ;;  %s5975_s5 = inlined_call_operand.vmem [shape: f32[1,512], index: 5, kind: input, shape index: {}]   ;;  %s5976_s8 = inlined_call_operand.vmem [shape: bf16[256,384], index: 8, kind: input, shape index: {}]   ;;  %s5977_s10 = inlined_call_operand.vmem [shape: bf16[384,128], index: 10, kind: input, shape index: {}]   ;;  %s5978_s7 = inlined_call_operand.vmem [shape: f32[1,256], index: 7, kind: input, shape index: {}]   ;;  %s5979_s9 = inlined_call_operand.vmem [shape: f32[1,384], index: 9, kind: input, shape index: {}]   ;;  %s5980_s11 = inlined_call_operand.vmem [shape: f32[1,128], index: 11, kind: input, shape index: {}]   ;;  %s5981_s12 = inlined_call_operand.vmem [shape: f32[16,128], index: 12, kind: output, shape index: {0}]   ;;  %s5982_s13 = inlined_call_operand.vmem [shape: f32[16,128], index: 13, kind: output, shape index: {1}]  }
   0x1   :  { %v4043_v0 = vld [vmem:[%s5969_s2 + $0xac] ss:$12 sps:$4 sm:$0xff]   ;;  %v4047_v2 = vld [vmem:[%s5969_s2 + $0xa8] ss:$12 sps:$4 sm:$0xff]   ;;  %v4053_v6 = vld [vmem:[%s5969_s2 + $0x90] ss:$12 sps:$4 sm:$0xff]  }
   0x2   :  { %v4045_v1 = vld [vmem:[%s5969_s2 + $0x22c] ss:$12 sps:$4 sm:$0xff]   ;;  %1057 = vmatprep.subr.bf16.mxu0 %v4043_v0  ;;  %v4048_v3 = vld [vmem:[%s5969_s2 + $0x228] ss:$12 sps:$4 sm:$0xff]   ;;  %v4054_v7 = vld [vmem:[%s5969_s2 + $0x210] ss:$12 sps:$4 sm:$0xff]  }
   0x3   :  { %1110 = vmatprep.subr.bf16.mxu1 %v4045_v1  ;;  %v4049_v4 = vld [vmem:[%s5969_s2 + $0x94] ss:$12 sps:$4 sm:$0xff]   ;;  %1058 = vmatpush1.bf16.msra.mxu0 %v4047_v2  ;;  %v4055_v8 = vld [vmem:[%s5969_s2 + $0x7c] ss:$12 sps:$4 sm:$0xff]   ;;  %v4059_v10 = vld [vmem:[%s5969_s2 + $0x78] ss:$12 sps:$4 sm:$0xff]  }
   0x4   :  { %1111 = vmatpush1.bf16.msra.mxu1 %v4048_v3  ;;  %v4051_v5 = vld [vmem:[%s5969_s2 + $0x214] ss:$12 sps:$4 sm:$0xff]   ;;  %1059 = vmatprep.subr.bf16.mxu0 %v4049_v4  ;;  %v4057_v9 = vld [vmem:[%s5969_s2 + $0x1fc] ss:$12 sps:$4 sm:$0xff]   ;;  %v4060_v11 = vld [vmem:[%s5969_s2 + $0x1f8] ss:$12 sps:$4 sm:$0xff]  }
   0x5   :  { %1112 = vmatprep.subr.bf16.mxu1 %v4051_v5  ;;  %v4061_v12 = vld [vmem:[%s5969_s2 + $0x64] ss:$12 sps:$4 sm:$0xff]   ;;  %v4065_v14 = vld [vmem:[%s5969_s2 + $0x60] ss:$12 sps:$4 sm:$0xff]   ;;  %v4071_v18 = vld [vmem:[%s5969_s2 + $0x48] ss:$12 sps:$4 sm:$0xff]  }
   0x6   :  { %v4063_v13 = vld [vmem:[%s5969_s2 + $0x1e4] ss:$12 sps:$4 sm:$0xff]   ;;  %v4066_v15 = vld [vmem:[%s5969_s2 + $0x1e0] ss:$12 sps:$4 sm:$0xff]   ;;  %v4072_v19 = vld [vmem:[%s5969_s2 + $0x1c8] ss:$12 sps:$4 sm:$0xff]  }
   0x7   :  { %1060 = vmatpush1.bf16.msra.mxu0 %v4053_v6  ;;  %v4067_v16 = vld [vmem:[%s5969_s2 + $0x4c] ss:$12 sps:$4 sm:$0xff]   ;;  %v4073_v20 = vld [vmem:[%s5969_s2 + $0x34] ss:$12 sps:$4 sm:$0xff]   ;;  %v4077_v22 = vld [vmem:[%s5969_s2 + $0x30] ss:$12 sps:$4 sm:$0xff]  }
   0x8   :  { %1113 = vmatpush1.bf16.msra.mxu1 %v4054_v7  ;;  %1061 = vmatprep.subr.bf16.mxu0 %v4055_v8  ;;  %v4069_v17 = vld [vmem:[%s5969_s2 + $0x1cc] ss:$12 sps:$4 sm:$0xff]   ;;  %v4075_v21 = vld [vmem:[%s5969_s2 + $0x1b4] ss:$12 sps:$4 sm:$0xff]   ;;  %v4078_v23 = vld [vmem:[%s5969_s2 + $0x1b0] ss:$12 sps:$4 sm:$0xff]  }
   0x9   :  { %1114 = vmatprep.subr.bf16.mxu1 %v4057_v9  ;;  %v4079_v24 = vld [vmem:[%s5969_s2 + $0x1c] ss:$12 sps:$4 sm:$0xff]   ;;  %v4083_v26 = vld [vmem:[%s5969_s2 + $0x18] ss:$12 sps:$4 sm:$0xff]   ;;  %v4089_v30 = vld [vmem:[%s5969_s2] ss:$12 sps:$4 sm:$0xff]  }
   0xa   :  { %v4081_v25 = vld [vmem:[%s5969_s2 + $0x19c] ss:$12 sps:$4 sm:$0xff]   ;;  %v4084_v27 = vld [vmem:[%s5969_s2 + $0x198] ss:$12 sps:$4 sm:$0xff]   ;;  %v4090_v31 = vld [vmem:[%s5969_s2 + $0x180] ss:$12 sps:$4 sm:$0xff]  }
   0xb   :  { %1062 = vmatpush1.bf16.msra.mxu0 %v4059_v10  ;;  %v4085_v28 = vld [vmem:[%s5969_s2 + $0x4] ss:$12 sps:$4 sm:$0xff]   ;;  %v4091_v32 = vld [vmem:[%s5969_s2 + $0x16c] ss:$12 sps:$4 sm:$0xff]   ;;  %v4095_v34 = vld [vmem:[%s5969_s2 + $0x168] ss:$12 sps:$4 sm:$0xff]  }
   0xc   :  { %1115 = vmatpush1.bf16.msra.mxu1 %v4060_v11  ;;  %1063 = vmatprep.subr.bf16.mxu0 %v4061_v12  ;;  %v4087_v29 = vld [vmem:[%s5969_s2 + $0x184] ss:$12 sps:$4 sm:$0xff]   ;;  %v4093_v33 = vld [vmem:[%s5969_s2 + $0x2ec] ss:$12 sps:$4 sm:$0xff]   ;;  %v4096_v35 = vld [vmem:[%s5969_s2 + $0x2e8] ss:$12 sps:$4 sm:$0xff]  }
   0xd   :  { %1116 = vmatprep.subr.bf16.mxu1 %v4063_v13  ;;  %v4097_v36 = vld [vmem:[%s5969_s2 + $0x154] ss:$12 sps:$4 sm:$0xff]   ;;  %v4101_v38 = vld [vmem:[%s5969_s2 + $0x150] ss:$12 sps:$4 sm:$0xff]   ;;  %v4107_v42 = vld [vmem:[%s5969_s2 + $0x138] ss:$12 sps:$4 sm:$0xff]  }
   0xe   :  { %v4099_v37 = vld [vmem:[%s5969_s2 + $0x2d4] ss:$12 sps:$4 sm:$0xff]   ;;  %v4102_v39 = vld [vmem:[%s5969_s2 + $0x2d0] ss:$12 sps:$4 sm:$0xff]   ;;  %v4108_v43 = vld [vmem:[%s5969_s2 + $0x2b8] ss:$12 sps:$4 sm:$0xff]  }
   0xf   :  { %1064 = vmatpush1.bf16.msra.mxu0 %v4065_v14  ;;  %v4103_v40 = vld [vmem:[%s5969_s2 + $0x13c] ss:$12 sps:$4 sm:$0xff]   ;;  %v4109_v44 = vld [vmem:[%s5969_s2 + $0x124] ss:$12 sps:$4 sm:$0xff]   ;;  %v4113_v47 = vld [vmem:[%s5969_s2 + $0x120] ss:$12 sps:$4 sm:$0xff]  }
  0x10   :  { %1117 = vmatpush1.bf16.msra.mxu1 %v4066_v15  ;;  %1065 = vmatprep.subr.bf16.mxu0 %v4067_v16  ;;  %v4105_v41 = vld [vmem:[%s5969_s2 + $0x2bc] ss:$12 sps:$4 sm:$0xff]   ;;  %v4111_v45 = vld [vmem:[%s5969_s2 + $0x2a4] ss:$12 sps:$4 sm:$0xff]   ;;  %v4114_v48 = vld [vmem:[%s5969_s2 + $0x2a0] ss:$12 sps:$4 sm:$0xff]  }
  0x11   :  { %1118 = vmatprep.subr.bf16.mxu1 %v4069_v17  ;;  %v45_v46 = vld [vmem:[%s5970_s0 + $0x8] sm:$0xff]  ;;  %v51_v49 = vld [vmem:[%s5970_s0 + $0x38] sm:$0xff]  ;;  %v4121_v58 = vld [vmem:[%s5969_s2 + $0xf4] ss:$12 sps:$4 sm:$0xff]  }
  0x12   :  { %v4784_v50 = vpack.c.bf16 %v51_v49, %v45_v46  ;;  %v47_v51 = vld [vmem:[%s5970_s0 + $0x18] sm:$0xff]  ;;  %v53_v52 = vld [vmem:[%s5970_s0 + $0x48] sm:$0xff]  ;;  %v4123_v59 = vld [vmem:[%s5969_s2 + $0x274] ss:$12 sps:$4 sm:$0xff]  }
  0x13   :  { %1066 = vmatpush1.bf16.msra.mxu0 %v4071_v18  ;;  %v4115_v53 = vld [vmem:[%s5969_s2 + $0x10c] ss:$12 sps:$4 sm:$0xff]   ;;  %v4798_v55 = vpack.c.bf16 %v53_v52, %v47_v51  ;;  %v4119_v56 = vld [vmem:[%s5969_s2 + $0x108] ss:$12 sps:$4 sm:$0xff]   ;;  %v4125_v60 = vld [vmem:[%s5969_s2 + $0xf0] ss:$12 sps:$4 sm:$0xff]  }
  0x14   :  { %1119 = vmatpush1.bf16.msra.mxu1 %v4072_v19  ;;  %1067 = vmatprep.subr.bf16.mxu0 %v4073_v20  ;;  %v4117_v54 = vld [vmem:[%s5969_s2 + $0x28c] ss:$12 sps:$4 sm:$0xff]   ;;  %v4120_v57 = vld [vmem:[%s5969_s2 + $0x288] ss:$12 sps:$4 sm:$0xff]   ;;  %v4126_v61 = vld [vmem:[%s5969_s2 + $0x270] ss:$12 sps:$4 sm:$0xff]  }
  0x15   :  { %1120 = vmatprep.subr.bf16.mxu1 %v4075_v21  ;;  %1089 = vmatprep.mubr.bf16.mxu0 %v4784_v50  ;;  %v4127_v62 = vld [vmem:[%s5969_s2 + $0xdc] ss:$12 sps:$4 sm:$0xff]   ;;  %v4131_v0 = vld [vmem:[%s5969_s2 + $0xd8] ss:$12 sps:$4 sm:$0xff]   ;;  %v4137_v4 = vld [vmem:[%s5969_s2 + $0xc0] ss:$12 sps:$4 sm:$0xff]  }
  0x16   :  { %1142 = vmatprep.mubr.bf16.mxu1 %v4798_v55  ;;  %v4129_v63 = vld [vmem:[%s5969_s2 + $0x25c] ss:$12 sps:$4 sm:$0xff]   ;;  %v4132_v1 = vld [vmem:[%s5969_s2 + $0x258] ss:$12 sps:$4 sm:$0xff]   ;;  %v4138_v5 = vld [vmem:[%s5969_s2 + $0x240] ss:$12 sps:$4 sm:$0xff]  }
  0x17   :  { %1068 = vmatpush1.bf16.msra.mxu0 %v4077_v22  ;;  %v4133_v2 = vld [vmem:[%s5969_s2 + $0xc4] ss:$12 sps:$4 sm:$0xff]   ;;  %v4141_v8 = vld [vmem:[%s5969_s2 + $0x3ac] ss:$12 sps:$4 sm:$0xff]   ;;  %v4139_v12 = vld [vmem:[%s5969_s2 + $0x3a8] ss:$12 sps:$4 sm:$0xff]  }
  0x18   :  { %1121 = vmatpush1.bf16.msra.mxu1 %v4078_v23  ;;  %1069 = vmatprep.subr.bf16.mxu0 %v4079_v24  ;;  %v4135_v3 = vld [vmem:[%s5969_s2 + $0x244] ss:$12 sps:$4 sm:$0xff]   ;;  %v4146_v16 = vld [vmem:[%s5969_s2 + $0x394] ss:$12 sps:$4 sm:$0xff]   ;;  %v65_v18 = vld [vmem:[%s5971_s1 + $0x18] sm:$0xff] }
  0x19   :  { %1122 = vmatprep.subr.bf16.mxu1 %v4081_v25  ;;  %v44_v6 = vld [vmem:[%s5970_s0] sm:$0xff]  ;;  %v50_v7 = vld [vmem:[%s5970_s0 + $0x30] sm:$0xff]  ;;  %v71_v19 = vld [vmem:[%s5971_s1 + $0x48] sm:$0xff] }
  0x1a   :  { %v46_v9 = vld [vmem:[%s5970_s0 + $0x10] sm:$0xff]  ;;  %v52_v10 = vld [vmem:[%s5970_s0 + $0x40] sm:$0xff]  ;;  %v4865_v13 = vpack.c.bf16 %v50_v7, %v44_v6  ;;  %v4887_v21 = vpack.c.bf16 %v71_v19, %v65_v18  ;;  %v4151_v23 = vld [vmem:[%s5969_s2 + $0x37c] ss:$12 sps:$4 sm:$0xff]  }
  0x1b   :  { %1070 = vmatpush1.bf16.msra.mxu0 %v4083_v26  ;;  %v4142_v11 = vld [vmem:[%s5969_s2 + $0x170] ss:$12 sps:$4 sm:$0xff]   ;;  %v4867_v14 = vpack.c.bf16 %v52_v10, %v46_v9  ;;  %v4147_v17 = vld [vmem:[%s5969_s2 + $0x158] ss:$12 sps:$4 sm:$0xff]   ;;  %v4152_v26 = vld [vmem:[%s5969_s2 + $0x140] ss:$12 sps:$4 sm:$0xff]  }
  0x1c   :  { %1123 = vmatpush1.bf16.msra.mxu1 %v4084_v27  ;;  %1071 = vmatprep.subr.bf16.mxu0 %v4085_v28  ;;  %v4143_v15 = vld [vmem:[%s5969_s2 + $0xb0] ss:$12 sps:$4 sm:$0xff]   ;;  %v4148_v22 = vld [vmem:[%s5969_s2 + $0x98] ss:$12 sps:$4 sm:$0xff]   ;;  %v4153_v28 = vld [vmem:[%s5969_s2 + $0x80] ss:$12 sps:$4 sm:$0xff]  }
  0x1d   :  { %1124 = vmatprep.subr.bf16.mxu1 %v4087_v29  ;;  %v4144_v20 = vld [vmem:[%s5969_s2 + $0x390] ss:$12 sps:$4 sm:$0xff]   ;;  %v70_v25 = vld [vmem:[%s5971_s1 + $0x40] sm:$0xff]  ;;  %v63_v46 = vld [vmem:[%s5971_s1 + $0x8] sm:$0xff] }
  0x1e   :  { %v64_v24 = vld [vmem:[%s5971_s1 + $0x10] sm:$0xff]  ;;  %v4149_v27 = vld [vmem:[%s5969_s2 + $0x378] ss:$12 sps:$4 sm:$0xff]   ;;  %v4193_v7 = vld [vmem:[%s5969_s2 + $0x200] ss:$12 sps:$4 sm:$0xff]  }
  0x1f   :  { %1072 = vmatpush1.bf16.msra.mxu0 %v4089_v30  ;;  %v4913_v29 = vpack.c.bf16 %v70_v25, %v64_v24  ;;  %v4156_v30 = vld [vmem:[%s5969_s2 + $0x364] ss:$12 sps:$4 sm:$0xff]   ;;  %v4197_v9 = vld [vmem:[%s5969_s2 + $0x2a8] ss:$12 sps:$4 sm:$0xff]   ;;  %v4194_v10 = vld [vmem:[%s5969_s2 + $0x420] ss:$12 sps:$4 sm:$0xff]  }
  0x20   :  { %1125 = vmatpush1.bf16.msra.mxu1 %v4090_v31  ;;  %1073 = vmatprep.subr.bf16.mxu0 %v4091_v32  ;;  %v4157_v31 = vld [vmem:[%s5969_s2 + $0x128] ss:$12 sps:$4 sm:$0xff]   ;;  %v4154_v32 = vld [vmem:[%s5969_s2 + $0x360] ss:$12 sps:$4 sm:$0xff]   ;;  %v4207_v18 = vld [vmem:[%s5969_s2 + $0x278] ss:$12 sps:$4 sm:$0xff]  }
  0x21   :  { %1126 = vmatprep.subr.bf16.mxu1 %v4093_v33  ;;  %v4158_v33 = vld [vmem:[%s5969_s2 + $0x68] ss:$12 sps:$4 sm:$0xff]   ;;  %v4208_v19 = vld [vmem:[%s5969_s2 + $0x1b8] ss:$12 sps:$4 sm:$0xff]   ;;  %v4213_v24 = vld [vmem:[%s5969_s2 + $0x1a0] ss:$12 sps:$4 sm:$0xff]  }
  0x22   :  { %v68_v49 = vld [vmem:[%s5971_s1 + $0x30] sm:$0xff] }
  0x23   :  { %1074 = vmatpush2.bf16.msra.mxu0 %v4095_v34  ;;  %v4161_v34 = vld [vmem:[%s5969_s2 + $0x34c] ss:$12 sps:$4 sm:$0xff]   ;;  %v4216_v25 = vld [vmem:[%s5969_s2 + $0x3c4] ss:$12 sps:$4 sm:$0xff]  }
  0x24   :  { %1127 = vmatpush2.bf16.msra.mxu1 %v4096_v35  ;;  %1075 = vmatprep.subr.bf16.mxu0 %v4097_v36  ;;  %v4162_v35 = vld [vmem:[%s5969_s2 + $0x110] ss:$12 sps:$4 sm:$0xff]   ;;  %v4159_v36 = vld [vmem:[%s5969_s2 + $0x348] ss:$12 sps:$4 sm:$0xff]  }
  0x25   :  { %1128 = vmatprep.subr.bf16.mxu1 %v4099_v37  ;;  %v4163_v37 = vld [vmem:[%s5969_s2 + $0x50] ss:$12 sps:$4 sm:$0xff]  }
  0x27   :  { %1076 = vmatpush2.bf16.msra.mxu0 %v4101_v38  ;;  %v4166_v38 = vld [vmem:[%s5969_s2 + $0x334] ss:$12 sps:$4 sm:$0xff]  }
  0x28   :  { %1129 = vmatpush2.bf16.msra.mxu1 %v4102_v39  ;;  %1077 = vmatprep.subr.bf16.mxu0 %v4103_v40  ;;  %v4167_v39 = vld [vmem:[%s5969_s2 + $0xf8] ss:$12 sps:$4 sm:$0xff]   ;;  %v4164_v40 = vld [vmem:[%s5969_s2 + $0x330] ss:$12 sps:$4 sm:$0xff]  }
  0x29   :  { %1130 = vmatprep.subr.bf16.mxu1 %v4105_v41  ;;  %v4168_v41 = vld [vmem:[%s5969_s2 + $0x38] ss:$12 sps:$4 sm:$0xff]  }
  0x2b   :  { %1078 = vmatpush2.bf16.msra.mxu0 %v4107_v42  ;;  %v4171_v42 = vld [vmem:[%s5969_s2 + $0x31c] ss:$12 sps:$4 sm:$0xff]  }
  0x2c   :  { %1131 = vmatpush2.bf16.msra.mxu1 %v4108_v43  ;;  %1079 = vmatprep.subr.bf16.mxu0 %v4109_v44  ;;  %v4172_v43 = vld [vmem:[%s5969_s2 + $0xe0] ss:$12 sps:$4 sm:$0xff]   ;;  %v4169_v44 = vld [vmem:[%s5969_s2 + $0x318] ss:$12 sps:$4 sm:$0xff]  }
  0x2d   :  { %1132 = vmatprep.subr.bf16.mxu1 %v4111_v45  ;;  %v4173_v45 = vld [vmem:[%s5969_s2 + $0x20] ss:$12 sps:$4 sm:$0xff]  }
  0x2f   :  { %1080 = vmatpush2.bf16.msra.mxu0 %v4113_v47  ;;  %v69_v47 = vld [vmem:[%s5971_s1 + $0x38] sm:$0xff] }
  0x30   :  { %1133 = vmatpush2.bf16.msra.mxu1 %v4114_v48  ;;  %1081 = vmatprep.subr.bf16.mxu0 %v4115_v53  ;;  %v62_v48 = vld [vmem:[%s5971_s1] sm:$0xff]  ;;  %v75_v51 = vpack.c.bf16 %v69_v47, %v63_v46  ;;  %v4177_v53 = vld [vmem:[%s5969_s2 + $0xc8] ss:$12 sps:$4 sm:$0xff]  }
  0x31   :  { %1134 = vmatprep.subr.bf16.mxu1 %v4117_v54  ;;  %v74_v52 = vpack.c.bf16 %v68_v49, %v62_v48  ;;  %v4174_v54 = vld [vmem:[%s5969_s2 + $0x300] ss:$12 sps:$4 sm:$0xff]   ;;  %v4240_v47 = vld [vmem:[%s5972_s4 + $0xc4] ss:$16 sps:$4 sm:$0xff]   ;;  %v4228_v48 = vld [vmem:[%s5969_s2 + $0x350] ss:$12 sps:$4 sm:$0xff]  }
  0x32   :  { %v4235_v46 = vld [vmem:[%s5972_s4 + $0xe0] ss:$16 sps:$4 sm:$0xff]   ;;  %v4229_v49 = vld [vmem:[%s5969_s2 + $0x3f8] ss:$12 sps:$4 sm:$0xff]  }
  0x33   :  { %1082 = vmatpush2.bf16.msra.mxu0 %v4119_v56  ;;  %v4178_v56 = vld [vmem:[%s5969_s2 + $0x8] ss:$12 sps:$4 sm:$0xff]  }
  0x34   :  { %1135 = vmatpush2.bf16.msra.mxu1 %v4120_v57  ;;  %1083 = vmatprep.subr.bf16.mxu0 %v4121_v58  ;;  %v4181_v57 = vld [vmem:[%s5969_s2 + $0x46c] ss:$12 sps:$4 sm:$0xff]   ;;  %v4182_v58 = vld [vmem:[%s5969_s2 + $0x2f0] ss:$12 sps:$4 sm:$0xff]  }
  0x35   :  { %1136 = vmatprep.subr.bf16.mxu1 %v4123_v59  ;;  %v4179_v59 = vld [vmem:[%s5969_s2 + $0x468] ss:$12 sps:$4 sm:$0xff]  }
  0x37   :  { %1084 = vmatpush2.bf16.msra.mxu0 %v4125_v60  ;;  %v4183_v60 = vld [vmem:[%s5969_s2 + $0x230] ss:$12 sps:$4 sm:$0xff]  }
  0x38   :  { %1137 = vmatpush2.bf16.msra.mxu1 %v4126_v61  ;;  %1085 = vmatprep.subr.bf16.mxu0 %v4127_v62  ;;  %v4186_v61 = vld [vmem:[%s5969_s2 + $0x454] ss:$12 sps:$4 sm:$0xff]   ;;  %v4187_v62 = vld [vmem:[%s5969_s2 + $0x2d8] ss:$12 sps:$4 sm:$0xff]  }
  0x39   :  { %1138 = vmatprep.subr.bf16.mxu1 %v4129_v63  ;;  %v4184_v63 = vld [vmem:[%s5969_s2 + $0x450] ss:$12 sps:$4 sm:$0xff]  }
  0x3b   :  { %1086 = vmatpush2.bf16.msra.mxu0 %v4131_v0  ;;  %v4188_v0 = vld [vmem:[%s5969_s2 + $0x218] ss:$12 sps:$4 sm:$0xff]  }
  0x3c   :  { %1139 = vmatpush2.bf16.msra.mxu1 %v4132_v1  ;;  %1087 = vmatprep.subr.bf16.mxu0 %v4133_v2  ;;  %v4191_v1 = vld [vmem:[%s5969_s2 + $0x43c] ss:$12 sps:$4 sm:$0xff]   ;;  %v4192_v2 = vld [vmem:[%s5969_s2 + $0x2c0] ss:$12 sps:$4 sm:$0xff]  }
  0x3d   :  { %1140 = vmatprep.subr.bf16.mxu1 %v4135_v3  ;;  %v49_v3 = vld [vmem:[%s5970_s0 + $0x28] sm:$0xff] }
  0x3f   :  { %1088 = vmatpush2.bf16.msra.mxu0 %v4137_v4  ;;  %v55_v4 = vld [vmem:[%s5970_s0 + $0x58] sm:$0xff] }
  0x40   :  { %1141 = vmatpush2.bf16.msra.mxu1 %v4138_v5  ;;  %1163 = vmatprep.subr.bf16.mxu0 %v4141_v8  ;;  %v4189_v5 = vld [vmem:[%s5969_s2 + $0x438] ss:$12 sps:$4 sm:$0xff]   ;;  %v5029_v6 = vpack.c.bf16 %v55_v4, %v49_v3  ;;  %v4256_v4 = vld [vmem:[%s5972_s4] ss:$16 sps:$4 sm:$0xff]  }
  0x41   :  { %3872 = vmatprep.subr.bf16.mxu1 %v4142_v11  ;;  %v4196_v8 = vld [vmem:[%s5969_s2 + $0x424] ss:$12 sps:$4 sm:$0xff]   ;;  %v4198_v11 = vld [vmem:[%s5969_s2 + $0x1e8] ss:$12 sps:$4 sm:$0xff]  }
  0x42   :  { %1090 = vmatmul.mubr.bf16.vlgmr.msra.gmra.mxu0 %v4865_v13  ;;  %v4258_v3 = vld [vmem:[%s5972_s4 + $0x4] ss:$16 sps:$4 sm:$0xff]  }
  0x43   :  { %1143 = vmatmul.mubr.bf16.vlgmr.msra.gmra.mxu1 %v4867_v14  ;;  %1164 = vmatpush1.bf16.msra.mxu0 %v4139_v12  ;;  %v4201_v12 = vld [vmem:[%s5969_s2 + $0x40c] ss:$12 sps:$4 sm:$0xff]  }
  0x44   :  { %3873 = vmatpush3.bf16.msra.mxu1 %v4143_v15  ;;  %1165 = vmatprep.subr.bf16.mxu0 %v4146_v16  ;;  %v4199_v15 = vld [vmem:[%s5969_s2 + $0x408] ss:$12 sps:$4 sm:$0xff]   ;;  %v4203_v16 = vld [vmem:[%s5969_s2 + $0x1d0] ss:$12 sps:$4 sm:$0xff]  }
  0x45   :  { %3874 = vmatprep.subr.bf16.mxu1 %v4147_v17  ;;  %1152 = vmatprep.mubr.bf16.mxu1 %v4887_v21  ;;  %v4206_v17 = vld [vmem:[%s5969_s2 + $0x3f4] ss:$12 sps:$4 sm:$0xff]  }
  0x46   :  { %1099 = vmatprep.mubr.bf16.mxu0 %v75_v51 }
  0x47   :  { %1166 = vmatpush1.bf16.msra.mxu0 %v4144_v20  ;;  %v4211_v20 = vld [vmem:[%s5969_s2 + $0x3dc] ss:$12 sps:$4 sm:$0xff]  }
  0x48   :  { %3875 = vmatpush3.bf16.msra.mxu1 %v4148_v22  ;;  %1167 = vmatprep.subr.bf16.mxu0 %v4151_v23  ;;  %v4212_v22 = vld [vmem:[%s5969_s2 + $0x260] ss:$12 sps:$4 sm:$0xff]   ;;  %v4209_v23 = vld [vmem:[%s5969_s2 + $0x3d8] ss:$12 sps:$4 sm:$0xff]  }
  0x49   :  { %3876 = vmatprep.subr.bf16.mxu1 %v4152_v26  ;;  %v4217_v26 = vld [vmem:[%s5969_s2 + $0x248] ss:$12 sps:$4 sm:$0xff]  }
  0x4a   :  { %1100 = vmatmul.mubr.bf16.gmra.mxu0 %v74_v52 }
  0x4b   :  { %1153 = vmatmul.mubr.bf16.gmra.mxu1 %v4913_v29  ;;  %1168 = vmatpush1.bf16.msra.mxu0 %v4149_v27  ;;  %v4214_v27 = vld [vmem:[%s5969_s2 + $0x3c0] ss:$12 sps:$4 sm:$0xff]  }
  0x4c   :  { %3877 = vmatpush3.bf16.msra.mxu1 %v4153_v28  ;;  %1169 = vmatprep.subr.bf16.mxu0 %v4156_v30  ;;  %v4218_v28 = vld [vmem:[%s5969_s2 + $0x188] ss:$12 sps:$4 sm:$0xff]   ;;  %v48_v30 = vld [vmem:[%s5970_s0 + $0x20] sm:$0xff] }
  0x4d   :  { %3878 = vmatprep.subr.bf16.mxu1 %v4157_v31  ;;  %1248 = vmatprep.mubr.bf16.mxu1 %v4784_v50  ;;  %v4176_v50 = vld [vmem:[%s5969_s2 + $0x304] ss:$12 sps:$4 sm:$0xff]  }
  0x4e   :  { %1195 = vmatprep.mubr.bf16.mxu0 %v5029_v6  ;;  %v54_v31 = vld [vmem:[%s5970_s0 + $0x50] sm:$0xff] }
  0x4f   :  { %1170 = vmatpush1.bf16.msra.mxu0 %v4154_v32  ;;  %v4219_v32 = vld [vmem:[%s5969_s2 + $0x470] ss:$12 sps:$4 sm:$0xff]  }
  0x50   :  { %3879 = vmatpush3.bf16.msra.mxu1 %v4158_v33  ;;  %1171 = vmatprep.subr.bf16.mxu0 %v4161_v34  ;;  %v67_v33 = vld [vmem:[%s5971_s1 + $0x28] sm:$0xff]  ;;  %v73_v34 = vld [vmem:[%s5971_s1 + $0x58] sm:$0xff] }
  0x51   :  { %3880 = vmatprep.subr.bf16.mxu1 %v4162_v35  ;;  %v5111_v35 = vpack.c.bf16 %v54_v31, %v48_v30  ;;  %v4301_v30 = vld [vmem:[%s5972_s4 + $0x280] ss:$16 sps:$4 sm:$0xff]   ;;  %v4303_v31 = vld [vmem:[%s5972_s4 + $0x284] ss:$16 sps:$4 sm:$0xff]  }
  0x53   :  { %1172 = vmatpush1.bf16.msra.mxu0 %v4159_v36  ;;  %v4220_v36 = vld [vmem:[%s5969_s2 + $0x3b0] ss:$12 sps:$4 sm:$0xff]  }
  0x54   :  { %3881 = vmatpush3.bf16.msra.mxu1 %v4163_v37  ;;  %1173 = vmatprep.subr.bf16.mxu0 %v4166_v38  ;;  %v5116_v37 = vpack.c.bf16 %v73_v34, %v67_v33  ;;  %v4221_v38 = vld [vmem:[%s5969_s2 + $0x458] ss:$12 sps:$4 sm:$0xff]  }
  0x55   :  { %3882 = vmatprep.subr.bf16.mxu1 %v4167_v39  ;;  %v4222_v39 = vld [vmem:[%s5969_s2 + $0x398] ss:$12 sps:$4 sm:$0xff]  }
  0x56   :  { %v4309_v33 = vld [vmem:[%s5972_s4 + $0x264] ss:$16 sps:$4 sm:$0xff]  }
  0x57   :  { %1174 = vmatpush1.bf16.msra.mxu0 %v4164_v40  ;;  %v66_v40 = vld [vmem:[%s5971_s1 + $0x20] sm:$0xff] }
  0x58   :  { %3883 = vmatpush3.bf16.msra.mxu1 %v4168_v41  ;;  %1175 = vmatprep.subr.bf16.mxu0 %v4171_v42  ;;  %v72_v41 = vld [vmem:[%s5971_s1 + $0x50] sm:$0xff] }
  0x59   :  { %3884 = vmatprep.subr.bf16.mxu1 %v4172_v43  ;;  %v78_v42 = vpack.c.bf16 %v72_v41, %v66_v40  ;;  %v4224_v43 = vld [vmem:[%s5969_s2 + $0x380] ss:$12 sps:$4 sm:$0xff]   ;;  %v4315_v34 = vld [vmem:[%s5972_s4 + $0x244] ss:$16 sps:$4 sm:$0xff]   ;;  %v4563_v41 = vmov 0  }
  0x5a   :  { %v4333_v40 = vld [vmem:[%s5972_s4 + $0xec] ss:$16 sps:$4 sm:$0xff]  }
  0x5b   :  { %1176 = vmatpush1.bf16.msra.mxu0 %v4169_v44  ;;  %v4225_v44 = vld [vmem:[%s5969_s2 + $0x428] ss:$12 sps:$4 sm:$0xff]  }
  0x5c   :  { %3885 = vmatpush3.bf16.msra.mxu1 %v4173_v45  ;;  %1177 = vmatprep.subr.bf16.mxu0 %v4176_v50  ;;  %v4226_v45 = vld [vmem:[%s5969_s2 + $0x368] ss:$12 sps:$4 sm:$0xff]   ;;  %v4238_v50 = vld [vmem:[%s5972_s4 + $0xc0] ss:$16 sps:$4 sm:$0xff]  }
  0x5d   :  { %3886 = vmatprep.subr.bf16.mxu1 %v4177_v53  ;;  %v4231_v53 = vld [vmem:[%s5969_s2 + $0x3e0] ss:$12 sps:$4 sm:$0xff]  }
  0x5f   :  { %1178 = vmatpush1.bf16.msra.mxu0 %v4174_v54  ;;  %v4241_v54 = vld [vmem:[%s5972_s4 + $0xa0] ss:$16 sps:$4 sm:$0xff]  }
  0x60   :  { %3887 = vmatpush3.bf16.msra.mxu1 %v4178_v56  ;;  %1179 = vmatprep.subr.bf16.mxu0 %v4181_v57  ;;  %v4246_v56 = vld [vmem:[%s5972_s4 + $0x84] ss:$16 sps:$4 sm:$0xff]   ;;  %v4232_v57 = vld [vmem:[%s5969_s2 + $0x320] ss:$12 sps:$4 sm:$0xff]  }
  0x61   :  { %3900 = vmatprep.subr.bf16.mxu1 %v4182_v58  ;;  %v4233_v58 = vld [vmem:[%s5969_s2 + $0x3c8] ss:$12 sps:$4 sm:$0xff]  }
  0x63   :  { %1249 = vmatmul.mubr.bf16.vlgmr.msra.gmra.mxu1 %v4865_v13  ;;  %1180 = vmatpush2.bf16.msra.mxu0 %v4179_v59  ;;  %v4202_v13 = vld [vmem:[%s5969_s2 + $0x290] ss:$12 sps:$4 sm:$0xff]  }
  0x64   :  { %3901 = vmatpush3.bf16.msra.mxu1 %v4183_v60  ;;  %1181 = vmatprep.subr.bf16.mxu0 %v4186_v61  ;;  %v4244_v59 = vld [vmem:[%s5972_s4 + $0x80] ss:$16 sps:$4 sm:$0xff]   ;;  %v4249_v60 = vld [vmem:[%s5972_s4 + $0x64] ss:$16 sps:$4 sm:$0xff]  }
  0x65   :  { %3902 = vmatprep.subr.bf16.mxu1 %v4187_v62  ;;  %1256 = vmatprep.mubr.bf16.mxu1 %v75_v51  ;;  %v4243_v51 = vld [vmem:[%s5972_s4 + $0xa4] ss:$16 sps:$4 sm:$0xff]   ;;  %v4247_v62 = vld [vmem:[%s5972_s4 + $0x60] ss:$16 sps:$4 sm:$0xff]  }
  0x66   :  { %v4234_v61 = vld [vmem:[%s5969_s2 + $0x308] ss:$12 sps:$4 sm:$0xff]  }
  0x67   :  { %1182 = vmatpush2.bf16.msra.mxu0 %v4184_v63  ;;  %v4252_v63 = vld [vmem:[%s5972_s4 + $0x44] ss:$16 sps:$4 sm:$0xff]  }
  0x68   :  { %3903 = vmatpush3.bf16.msra.mxu1 %v4188_v0  ;;  %1183 = vmatprep.subr.bf16.mxu0 %v4191_v1  ;;  %v4250_v0 = vld [vmem:[%s5972_s4 + $0x40] ss:$16 sps:$4 sm:$0xff]   ;;  %v4255_v1 = vld [vmem:[%s5972_s4 + $0x24] ss:$16 sps:$4 sm:$0xff]  }
  0x69   :  { %3904 = vmatprep.subr.bf16.mxu1 %v4192_v2  ;;  %v4253_v2 = vld [vmem:[%s5972_s4 + $0x20] ss:$16 sps:$4 sm:$0xff]  }
  0x6b   :  { %1257 = vmatmul.mubr.bf16.gmra.mxu1 %v74_v52  ;;  %1184 = vmatpush2.bf16.msra.mxu0 %v4189_v5  ;;  %v4230_v52 = vld [vmem:[%s5969_s2 + $0x338] ss:$12 sps:$4 sm:$0xff]  }
  0x6c   :  { %3905 = vmatpush3.bf16.msra.mxu1 %v4193_v7  ;;  %1185 = vmatprep.subr.bf16.mxu0 %v4196_v8  ;;  %v4261_v5 = vld [vmem:[%s5972_s4 + $0x1e4] ss:$16 sps:$4 sm:$0xff]   ;;  %v4262_v8 = vld [vmem:[%s5972_s4 + $0x1c0] ss:$16 sps:$4 sm:$0xff]  }
  0x6d   :  { %3906 = vmatprep.subr.bf16.mxu1 %v4197_v9  ;;  %1297 = vmatprep.mubr.bf16.mxu1 %v4798_v55  ;;  %v4204_v55 = vld [vmem:[%s5969_s2 + $0x3f0] ss:$12 sps:$4 sm:$0xff]   ;;  %v4264_v7 = vld [vmem:[%s5972_s4 + $0x1c4] ss:$16 sps:$4 sm:$0xff]  }
  0x6e   :  { %v4267_v9 = vld [vmem:[%s5972_s4 + $0x1a4] ss:$16 sps:$4 sm:$0xff]  }
  0x6f   :  { %1186 = vmatpush2.bf16.msra.mxu0 %v4194_v10  ;;  %v4265_v10 = vld [vmem:[%s5972_s4 + $0x1a0] ss:$16 sps:$4 sm:$0xff]  }
  0x70   :  { %3907 = vmatpush3.bf16.msra.mxu1 %v4198_v11  ;;  %1187 = vmatprep.subr.bf16.mxu0 %v4201_v12  ;;  %v4270_v11 = vld [vmem:[%s5972_s4 + $0x184] ss:$16 sps:$4 sm:$0xff]   ;;  %v4268_v12 = vld [vmem:[%s5972_s4 + $0x180] ss:$16 sps:$4 sm:$0xff]  }
  0x71   :  { %3908 = vmatprep.subr.bf16.mxu1 %v4202_v13  ;;  %v4273_v13 = vld [vmem:[%s5972_s4 + $0x164] ss:$16 sps:$4 sm:$0xff]  }
  0x73   :  { %1188 = vmatpush2.bf16.msra.mxu0 %v4199_v15  ;;  %v4271_v15 = vld [vmem:[%s5972_s4 + $0x160] ss:$16 sps:$4 sm:$0xff]  }
  0x74   :  { %3909 = vmatpush3.bf16.msra.mxu1 %v4203_v16  ;;  %1189 = vmatprep.subr.bf16.mxu0 %v4206_v17  ;;  %v4276_v16 = vld [vmem:[%s5972_s4 + $0x144] ss:$16 sps:$4 sm:$0xff]   ;;  %v4274_v17 = vld [vmem:[%s5972_s4 + $0x140] ss:$16 sps:$4 sm:$0xff]  }
  0x75   :  { %3910 = vmatprep.subr.bf16.mxu1 %v4207_v18  ;;  %v4279_v18 = vld [vmem:[%s5972_s4 + $0x124] ss:$16 sps:$4 sm:$0xff]  }
  0x77   :  { %1190 = vmatpush2.bf16.msra.mxu0 %v4204_v55  ;;  %v4277_v55 = vld [vmem:[%s5972_s4 + $0x120] ss:$16 sps:$4 sm:$0xff]  }
  0x78   :  { %3911 = vmatpush3.bf16.msra.mxu1 %v4208_v19  ;;  %1191 = vmatprep.subr.bf16.mxu0 %v4211_v20  ;;  %v4282_v19 = vld [vmem:[%s5972_s4 + $0x104] ss:$16 sps:$4 sm:$0xff]   ;;  %v4280_v20 = vld [vmem:[%s5972_s4 + $0x100] ss:$16 sps:$4 sm:$0xff]  }
  0x79   :  { %3912 = vmatprep.subr.bf16.mxu1 %v4212_v22  ;;  %v4285_v22 = vld [vmem:[%s5972_s4 + $0x2e4] ss:$16 sps:$4 sm:$0xff]  }
  0x7b   :  { %1192 = vmatpush2.bf16.msra.mxu0 %v4209_v23  ;;  %v4283_v23 = vld [vmem:[%s5972_s4 + $0x2e0] ss:$16 sps:$4 sm:$0xff]  }
  0x7c   :  { %3913 = vmatpush3.bf16.msra.mxu1 %v4213_v24  ;;  %1193 = vmatprep.subr.bf16.mxu0 %v4216_v25  ;;  %v4288_v24 = vld [vmem:[%s5972_s4 + $0x2ec] ss:$16 sps:$4 sm:$0xff]   ;;  %v4291_v25 = vld [vmem:[%s5972_s4 + $0x2c4] ss:$16 sps:$4 sm:$0xff]  }
  0x7d   :  { %3914 = vmatprep.subr.bf16.mxu1 %v4217_v26  ;;  %v4289_v26 = vld [vmem:[%s5972_s4 + $0x2c0] ss:$16 sps:$4 sm:$0xff]  }
  0x7f   :  { %1194 = vmatpush2.bf16.msra.mxu0 %v4214_v27  ;;  %v4297_v27 = vld [vmem:[%s5972_s4 + $0x2a4] ss:$16 sps:$4 sm:$0xff]  }
  0x80   :  { %3915 = vmatpush3.bf16.msra.mxu1 %v4218_v28  ;;  %3928 = vmatprep.subr.bf16.mxu0 %v4219_v32  ;;  %v4295_v28 = vld [vmem:[%s5972_s4 + $0x2a0] ss:$16 sps:$4 sm:$0xff]  }
  0x81   :  { %v4307_v32 = vld [vmem:[%s5972_s4 + $0x260] ss:$16 sps:$4 sm:$0xff]  }
  0x82   :  { %1196 = vmatmul.mubr.bf16.vlgmr.msra.gmra.mxu0 %v5111_v35 }
  0x83   :  { %1298 = vmatmul.mubr.bf16.vlgmr.msra.gmra.mxu1 %v4867_v14  ;;  %3929 = vmatpush3.bf16.msra.mxu0 %v4220_v36  ;;  %v4223_v14 = vld [vmem:[%s5969_s2 + $0x440] ss:$12 sps:$4 sm:$0xff]   ;;  %v4321_v36 = vld [vmem:[%s5972_s4 + $0x224] ss:$16 sps:$4 sm:$0xff]  }
  0x84   :  { %1205 = vmatprep.mubr.bf16.mxu0 %v5116_v37  ;;  %3930 = vmatprep.subr.bf16.mxu0 %v4221_v38  ;;  %v4327_v38 = vld [vmem:[%s5972_s4 + $0x204] ss:$16 sps:$4 sm:$0xff]  }
  0x85   :  { %1305 = vmatprep.mubr.bf16.mxu1 %v4887_v21  ;;  %v4227_v21 = vld [vmem:[%s5969_s2 + $0x410] ss:$12 sps:$4 sm:$0xff]  }
  0x87   :  { %3931 = vmatpush3.bf16.msra.mxu0 %v4222_v39  ;;  %v4325_v39 = vld [vmem:[%s5972_s4 + $0x200] ss:$16 sps:$4 sm:$0xff]  }
  0x88   :  { %3932 = vmatprep.subr.bf16.mxu0 %v4223_v14 }
  0x8a   :  { %1206 = vmatmul.mubr.bf16.gmra.mxu0 %v78_v42 }
  0x8b   :  { %1306 = vmatmul.mubr.bf16.gmra.mxu1 %v4913_v29  ;;  %3933 = vmatpush3.bf16.msra.mxu0 %v4224_v43  ;;  %v4237_v29 = vld [vmem:[%s5972_s4 + $0xe4] ss:$16 sps:$4 sm:$0xff]  }
  0x8c   :  { %1346 = vmatprep.mubr.bf16.mxu0 %v5029_v6  ;;  %3934 = vmatprep.subr.bf16.mxu0 %v4225_v44  ;;  %v4259_v6 = vld [vmem:[%s5972_s4 + $0x1e0] ss:$16 sps:$4 sm:$0xff]  }
  0x8d   :  { %1979 = vmatprep.subr.bf16.mxu1 %v4237_v29 }
  0x8e   :  { %1980 = vmatpush1.bf16.msra.mxu1 %v4235_v46 }
  0x8f   :  { %3935 = vmatpush3.bf16.msra.mxu0 %v4226_v45  ;;  %1981 = vmatprep.subr.bf16.mxu1 %v4240_v47 }
  0x90   :  { %3936 = vmatprep.subr.bf16.mxu0 %v4227_v21 }
  0x92   :  { %1982 = vmatpush1.bf16.msra.mxu1 %v4238_v50 }
  0x93   :  { %3937 = vmatpush3.bf16.msra.mxu0 %v4228_v48  ;;  %1983 = vmatprep.subr.bf16.mxu1 %v4243_v51  ;;  %v274_v51 = vlaneseq }
  0x94   :  { %3938 = vmatprep.subr.bf16.mxu0 %v4229_v49 }
  0x96   :  { %1984 = vmatpush1.bf16.msra.mxu1 %v4241_v54 }
  0x97   :  { %3939 = vmatpush3.bf16.msra.mxu0 %v4230_v52  ;;  %1985 = vmatprep.subr.bf16.mxu1 %v4246_v56  ;;  %v5329_v56 = vshrl.u32 %v274_v51, 7 }
  0x98   :  { %3940 = vmatprep.subr.bf16.mxu0 %v4231_v53 }
  0x9a   :  { %1986 = vmatpush1.bf16.msra.mxu1 %v4244_v59  ;;  %v5334_v59 = vsub.s32 1, %v5329_v56 }
  0x9b   :  { %3941 = vmatpush3.bf16.msra.mxu0 %v4232_v57  ;;  %1987 = vmatprep.subr.bf16.mxu1 %v4249_v60  ;;  %v5339_v60 = vld [vmem:[%s5973_s3] sm:$0x7] }
  0x9c   :  { %3942 = vmatprep.subr.bf16.mxu0 %v4233_v58 }
  0x9e   :  { %1988 = vmatpush1.bf16.msra.mxu1 %v4247_v62 }
  0x9f   :  { %3943 = vmatpush3.bf16.msra.mxu0 %v4234_v61  ;;  %1989 = vmatprep.subr.bf16.mxu1 %v4252_v63  ;;  %v5342_v61 = vsub.s32 0, %v5329_v56 }
  0xa0   :  { %2032 = vmatprep.subr.bf16.mxu0 %v4285_v22 }
  0xa2   :  { %1347 = vmatmul.mubr.bf16.vlgmr.msra.gmra.mxu0 %v5111_v35  ;;  %1990 = vmatpush1.bf16.msra.mxu1 %v4250_v0  ;;  %v4313_v35 = vld [vmem:[%s5972_s4 + $0x240] ss:$16 sps:$4 sm:$0xff]   ;;  %v281_v0 = vrot.slane %v5339_v60, %v5334_v59 }
  0xa3   :  { %1354 = vmatprep.mubr.bf16.mxu0 %v5116_v37  ;;  %1991 = vmatprep.subr.bf16.mxu1 %v4255_v1  ;;  %v4319_v37 = vld [vmem:[%s5972_s4 + $0x220] ss:$16 sps:$4 sm:$0xff]   ;;  %v277_v1 = vrot.slane %v5339_v60, %v5342_v61 }
  0xa4   :  { %2033 = vmatpush1.bf16.msra.mxu0 %v4283_v23 }
  0xa5   :  { %2034 = vmatprep.subr.bf16.mxu0 %v4291_v25 }
  0xa6   :  { %1992 = vmatpush1.bf16.msra.mxu1 %v4253_v2 }
  0xa7   :  { %1993 = vmatprep.subr.bf16.mxu1 %v4258_v3 }
  0xa8   :  { %2035 = vmatpush1.bf16.msra.mxu0 %v4289_v26 }
  0xa9   :  { %2036 = vmatprep.subr.bf16.mxu0 %v4297_v27 }
  0xaa   :  { %1355 = vmatmul.mubr.bf16.gmra.mxu0 %v78_v42  ;;  %1994 = vmatpush1.bf16.msra.mxu1 %v4256_v4 }
  0xab   :  { %1995 = vmatprep.subr.bf16.mxu1 %v4261_v5  ;;  %2064 = vmatprep.mubr.bf16.mxu0 %v4563_v41 }
  0xac   :  { %2037 = vmatpush1.bf16.msra.mxu0 %v4295_v28 }
  0xad   :  { %2038 = vmatprep.subr.bf16.mxu0 %v4303_v31 }
  0xae   :  { %1996 = vmatpush2.bf16.msra.mxu1 %v4259_v6 }
  0xaf   :  { %1997 = vmatprep.subr.bf16.mxu1 %v4264_v7 }
  0xb0   :  { %2039 = vmatpush1.bf16.msra.mxu0 %v4301_v30 }
  0xb1   :  { %2040 = vmatprep.subr.bf16.mxu0 %v4309_v33 }
  0xb2   :  { %1998 = vmatpush2.bf16.msra.mxu1 %v4262_v8 }
  0xb3   :  { %1999 = vmatprep.subr.bf16.mxu1 %v4267_v9 }
  0xb4   :  { %2041 = vmatpush1.bf16.msra.mxu0 %v4307_v32  ;;  %v4286_v32 = vld [vmem:[%s5972_s4 + $0x2e8] ss:$16 sps:$4 sm:$0xff]  }
  0xb5   :  { %2042 = vmatprep.subr.bf16.mxu0 %v4315_v34 }
  0xb6   :  { %2000 = vmatpush2.bf16.msra.mxu1 %v4265_v10 }
  0xb7   :  { %2001 = vmatprep.subr.bf16.mxu1 %v4270_v11 }
  0xb8   :  { %2043 = vmatpush1.bf16.msra.mxu0 %v4313_v35 }
  0xb9   :  { %2044 = vmatprep.subr.bf16.mxu0 %v4321_v36  ;;  %v4294_v36 = vld [vmem:[%s5972_s4 + $0x2cc] ss:$16 sps:$4 sm:$0xff]  }
  0xba   :  { %2002 = vmatpush2.bf16.msra.mxu1 %v4268_v12 }
  0xbb   :  { %2003 = vmatprep.subr.bf16.mxu1 %v4273_v13 }
  0xbc   :  { %2045 = vmatpush1.bf16.msra.mxu0 %v4319_v37 }
  0xbd   :  { %2046 = vmatprep.subr.bf16.mxu0 %v4327_v38 }
  0xbe   :  { %2004 = vmatpush2.bf16.msra.mxu1 %v4271_v15 }
  0xbf   :  { %2005 = vmatprep.subr.bf16.mxu1 %v4276_v16 }
  0xc0   :  { %2047 = vmatpush1.bf16.msra.mxu0 %v4325_v39 }
  0xc1   :  { %2085 = vmatprep.subr.bf16.mxu0 %v4333_v40 }
  0xc2   :  { %2006 = vmatpush2.bf16.msra.mxu1 %v4274_v17 }
  0xc3   :  { %2007 = vmatprep.subr.bf16.mxu1 %v4279_v18 }
  0xc6   :  { %2008 = vmatpush2.bf16.msra.mxu1 %v4277_v55 }
  0xc7   :  { %2009 = vmatprep.subr.bf16.mxu1 %v4282_v19 }
  0xca   :  { %2010 = vmatpush2.bf16.msra.mxu1 %v4280_v20 }
  0xcb   :  { %2138 = vmatprep.subr.bf16.mxu1 %v4288_v24 }
 0x102   :  { %v1091_v46 = vpop.f32.mrf.mxu0 }
 0x103   :  { %v1144_v14 = vpop.f32.mrf.mxu1  ;;  %v1092_v6 = vadd.f32 %v1091_v46, %v277_v1 }
 0x104   :  { %v1093_v47 = vpop.f32.mrf.mxu0 }
 0x105   :  { %v1146_v42 = vpop.f32.mrf.mxu1  ;;  %v1094_v4 = vadd.f32 %v1093_v47, %v281_v0  ;;  %v1145_v13 = vadd.f32 %v1144_v14, %v1092_v6  ;;  %v4292_v47 = vld [vmem:[%s5972_s4 + $0x2c8] ss:$16 sps:$4 sm:$0xff]  }
 0x106   :  { %v1095_v49 = vpop.f32.mrf.mxu0  ;;  %v4304_v6 = vld [vmem:[%s5972_s4 + $0x288] ss:$16 sps:$4 sm:$0xff]  }
 0x107   :  { %v1148_v43 = vpop.f32.mrf.mxu1  ;;  %v1096_v5 = vadd.f32 %v1095_v49, %v277_v1  ;;  %v1147_v11 = vadd.f32 %v1146_v42, %v1094_v4  ;;  %v4306_v4 = vld [vmem:[%s5972_s4 + $0x28c] ss:$16 sps:$4 sm:$0xff]  }
 0x108   :  { %v1097_v52 = vpop.f32.mrf.mxu0 }
 0x109   :  { %v1150_v44 = vpop.f32.mrf.mxu1  ;;  %v1098_v8 = vadd.f32 %v1097_v52, %v281_v0  ;;  %v1149_v12 = vadd.f32 %v1148_v43, %v1096_v5 }
 0x10a   :  { %v1101_v53 = vpop.f32.mrf.mxu0 }
 0x10b   :  { %v1154_v45 = vpop.f32.mrf.mxu1  ;;  %v1151_v16 = vadd.f32 %v1150_v44, %v1098_v8  ;;  %v1102_v25 = vadd.f32 %v1101_v53, %v277_v1  ;;  %v5396_v8 = vsub.s32 2, %v5329_v56 }
 0x10c   :  { %v1103_v57 = vpop.f32.mrf.mxu0 }
 0x10d   :  { %v1156_v21 = vpop.f32.mrf.mxu1  ;;  %v1104_v22 = vadd.f32 %v1103_v57, %v281_v0  ;;  %v1155_v14 = vadd.f32 %v1154_v45, %v1102_v25 }
 0x10e   :  { %v1105_v62 = vpop.f32.mrf.mxu0 }
 0x10f   :  { %v1158_v29 = vpop.f32.mrf.mxu1  ;;  %v1106_v23 = vadd.f32 %v1105_v62, %v277_v1  ;;  %v1157_v38 = vadd.f32 %v1156_v21, %v1104_v22  ;;  %v4300_v21 = vld [vmem:[%s5972_s4 + $0x2ac] ss:$16 sps:$4 sm:$0xff]   ;;  %v4298_v1 = vld [vmem:[%s5972_s4 + $0x2a8] ss:$16 sps:$4 sm:$0xff]  }
 0x110   :  { %v1107_v2 = vpop.f32.mrf.mxu0 }
 0x111   :  { %v1160_v48 = vpop.f32.mrf.mxu1  ;;  %v1108_v28 = vadd.f32 %v1107_v2, %v281_v0  ;;  %v1159_v39 = vadd.f32 %v1158_v29, %v1106_v23 }
 0x113   :  { %v1161_v46 = vadd.f32 %v1160_v48, %v1108_v28  ;;  %v4330_v28 = vld [vmem:[%s5972_s4 + $0x20c] ss:$16 sps:$4 sm:$0xff]  }
 0x123   :  { %v5325_v50 = vpop.f32.mrf.mxu1 }
 0x125   :  { %v5327_v54 = vpop.f32.mrf.mxu1 }
 0x127   :  { %v5331_v58 = vpop.f32.mrf.mxu1 }
 0x129   :  { %v5344_v63 = vpop.f32.mrf.mxu1 }
 0x12a   :  { %v3893_v23 = vadd.f32 %v5344_v63, %v5331_v58 }
 0x12b   :  { %v5350_v3 = vpop.f32.mrf.mxu1 }
 0x12d   :  { %v5352_v9 = vpop.f32.mrf.mxu1 }
 0x12e   :  { %v3896_v58 = vadd.f32 %v5352_v9, %v5350_v3  ;;  %v4381_v3 = vld [vmem:[%s5974_s6 + $0x74] ss:$8 sps:$4 sm:$0xff]  }
 0x12f   :  { %v5354_v55 = vpop.f32.mrf.mxu1 }
 0x131   :  { %v5359_v33 = vpop.f32.mrf.mxu1 }
 0x142   :  { %v1197_v7 = vpop.f32.mrf.mxu0 }
 0x143   :  { %v1198_v19 = vadd.f32 %v1197_v7, %v1145_v13  ;;  %v3916_v49 = vpop.f32.mrf.mxu1  ;;  %v4312_v7 = vld [vmem:[%s5972_s4 + $0x26c] ss:$16 sps:$4 sm:$0xff]  }
 0x144   :  { %v1199_v10 = vpop.f32.mrf.mxu0  ;;  %v4318_v13 = vld [vmem:[%s5972_s4 + $0x24c] ss:$16 sps:$4 sm:$0xff]  }
 0x145   :  { %v1200_v17 = vadd.f32 %v1199_v10, %v1147_v11  ;;  %v1363_v34 = vmax.f32 %v1198_v19, 0.0  ;;  %v3917_v48 = vpop.f32.mrf.mxu1  ;;  %v4310_v11 = vld [vmem:[%s5972_s4 + $0x268] ss:$16 sps:$4 sm:$0xff]  }
 0x146   :  { %v1201_v15 = vpop.f32.mrf.mxu0 }
 0x147   :  { %v1202_v18 = vadd.f32 %v1201_v15, %v1149_v12  ;;  %v1364_v30 = vmax.f32 %v1200_v17, 0.0  ;;  %v3919_v5 = vpop.f32.mrf.mxu1  ;;  %v285_v15 = vrot.slane %v5339_v60, %v5396_v8  ;;  %v4316_v17 = vld [vmem:[%s5972_s4 + $0x248] ss:$16 sps:$4 sm:$0xff]   ;;  %v3918_v60 = vadd.f32 %v3917_v48, %v3916_v49 }
 0x148   :  { %v1203_v20 = vpop.f32.mrf.mxu0 }
 0x149   :  { %v1204_v24 = vadd.f32 %v1203_v20, %v1151_v16  ;;  %v1366_v26 = vmax.f32 %v1202_v18, 0.0  ;;  %v3920_v10 = vpop.f32.mrf.mxu1  ;;  %v3890_v16 = vadd.f32 %v5327_v54, %v5325_v50  ;;  %v4324_v20 = vld [vmem:[%s5972_s4 + $0x22c] ss:$16 sps:$4 sm:$0xff]   ;;  %v4322_v54 = vld [vmem:[%s5972_s4 + $0x228] ss:$16 sps:$4 sm:$0xff]   ;;  %v1259_v9 = vadd.f32 %v3896_v58, %v285_v15 }
 0x14a   :  { %v1207_v27 = vpop.f32.mrf.mxu0  ;;  %v3921_v25 = vadd.f32 %v3920_v10, %v3919_v5  ;;  %v4334_v5 = vld [vmem:[%s5972_s4 + $0xc8] ss:$16 sps:$4 sm:$0xff]   ;;  %v4360_v58 = vld [vmem:[%s5972_s4 + $0x1cc] ss:$16 sps:$4 sm:$0xff]  }
 0x14b   :  { %v1367_v31 = vmax.f32 %v1204_v24, 0.0  ;;  %v5366_v40 = vpack.c.bf16 %v1366_v26, %v1363_v34  ;;  %v1208_v51 = vadd.f32 %v1207_v27, %v1155_v14  ;;  %v3922_v12 = vpop.f32.mrf.mxu1  ;;  %v1251_v22 = vadd.f32 %v3890_v16, %v285_v15  ;;  %v4382_v10 = vld [vmem:[%s5974_s6 + $0x60] ss:$8 sps:$4 sm:$0xff]   ;;  %v4342_v16 = vld [vmem:[%s5972_s4 + $0x8c] ss:$16 sps:$4 sm:$0xff]  }
 0x14c   :  { %v1209_v35 = vpop.f32.mrf.mxu0 }
 0x14d   :  { %v5364_v37 = vpack.c.bf16 %v1367_v31, %v1364_v30  ;;  %v1210_v43 = vadd.f32 %v1209_v35, %v1157_v38  ;;  %v1369_v62 = vmax.f32 %v1208_v51, 0.0  ;;  %v3923_v18 = vpop.f32.mrf.mxu1  ;;  %v1254_v30 = vadd.f32 %v3893_v23, %v285_v15  ;;  %v4328_v38 = vld [vmem:[%s5972_s4 + $0x208] ss:$16 sps:$4 sm:$0xff]  }
 0x14e   :  { %v1211_v42 = vpop.f32.mrf.mxu0  ;;  %v1300_v63 = vadd.f32 %v3918_v60, %v1251_v22  ;;  %v3899_v31 = vadd.f32 %v5359_v33, %v5354_v55  ;;  %v4388_v22 = vld [vmem:[%s5974_s6 + $0x40] ss:$8 sps:$4 sm:$0xff]   ;;  %v4348_v60 = vld [vmem:[%s5972_s4 + $0x4c] ss:$16 sps:$4 sm:$0xff]  }
 0x14f   :  { %v1212_v44 = vadd.f32 %v1211_v42, %v1159_v39  ;;  %2011 = vmatprep.mubr.bf16.mxu1 %v5364_v37  ;;  %v1370_v53 = vmax.f32 %v1210_v43, 0.0  ;;  %v3925_v26 = vpop.f32.mrf.mxu1  ;;  %v1303_v34 = vadd.f32 %v3921_v25, %v1254_v30  ;;  %v3924_v42 = vadd.f32 %v3923_v18, %v3922_v12  ;;  %v4390_v18 = vld [vmem:[%s5974_s6 + $0x44] ss:$8 sps:$4 sm:$0xff]   ;;  %v4343_v23 = vld [vmem:[%s5972_s4 + $0x68] ss:$16 sps:$4 sm:$0xff]  }
 0x150   :  { %v1213_v52 = vpop.f32.mrf.mxu0  ;;  %2012 = vmatmul.mubr.bf16.vlgmr.msra.gmra.mxu1 %v5366_v40  ;;  %v1262_v55 = vadd.f32 %v3899_v31, %v285_v15  ;;  %v4346_v25 = vld [vmem:[%s5972_s4 + $0x48] ss:$16 sps:$4 sm:$0xff]   ;;  %v4396_v31 = vld [vmem:[%s5974_s6 + $0x24] ss:$8 sps:$4 sm:$0xff]  }
 0x151   :  { %v1214_v45 = vadd.f32 %v1213_v52, %v1161_v46  ;;  %2139 = vmatpush1.bf16.msra.mxu1 %v4286_v32  ;;  %v1372_v29 = vmax.f32 %v1212_v44, 0.0  ;;  %v3926_v39 = vpop.f32.mrf.mxu1  ;;  %v4331_v52 = vld [vmem:[%s5972_s4 + $0xe8] ss:$16 sps:$4 sm:$0xff]  }
 0x152   :  { %2140 = vmatprep.subr.bf16.mxu1 %v4294_v36  ;;  %v3927_v44 = vadd.f32 %v3926_v39, %v3925_v26  ;;  %v4354_v26 = vld [vmem:[%s5972_s4 + $0xc] ss:$16 sps:$4 sm:$0xff]   ;;  %v4355_v30 = vld [vmem:[%s5972_s4 + $0x1e8] ss:$16 sps:$4 sm:$0xff]  }
 0x153   :  { %v1373_v57 = vmax.f32 %v1214_v45, 0.0  ;;  %v5381_v2 = vpack.c.bf16 %v1372_v29, %v1369_v62  ;;  %v4336_v29 = vld [vmem:[%s5972_s4 + $0xcc] ss:$16 sps:$4 sm:$0xff]   ;;  %v4397_v39 = vld [vmem:[%s5974_s6 + $0x10] ss:$8 sps:$4 sm:$0xff]  }
 0x154   :  { %v1311_v48 = vadd.f32 %v3927_v44, %v1262_v55  ;;  %v4405_v55 = vld [vmem:[%s5974_s6 + $0xf4] ss:$8 sps:$4 sm:$0xff]   ;;  %v4403_v44 = vld [vmem:[%s5974_s6 + $0xf0] ss:$8 sps:$4 sm:$0xff]  }
 0x155   :  { %v5376_v0 = vpack.c.bf16 %v1373_v57, %v1370_v53  ;;  %2141 = vmatpush1.bf16.msra.mxu1 %v4292_v47  ;;  %v4379_v57 = vld [vmem:[%s5974_s6 + $0x70] ss:$8 sps:$4 sm:$0xff]  }
 0x156   :  { %2142 = vmatprep.subr.bf16.mxu1 %v4300_v21  ;;  %v1308_v21 = vadd.f32 %v3924_v42, %v1259_v9  ;;  %v4369_v9 = vld [vmem:[%s5972_s4 + $0x16c] ss:$16 sps:$4 sm:$0xff]   ;;  %v4400_v42 = vld [vmem:[%s5974_s6] ss:$8 sps:$4 sm:$0xff]  }
 0x157   :  { %2021 = vmatprep.mubr.bf16.mxu1 %v5376_v0 }
 0x158   :  { %2022 = vmatmul.mubr.bf16.gmra.mxu1 %v5381_v2 }
 0x159   :  { %2143 = vmatpush1.bf16.msra.mxu1 %v4298_v1  ;;  %2170 = vmatprep.mubr.bf16.mxu1 %v4563_v41 }
 0x15a   :  { %2144 = vmatprep.subr.bf16.mxu1 %v4306_v4  ;;  %v4384_v4 = vld [vmem:[%s5974_s6 + $0x64] ss:$8 sps:$4 sm:$0xff]  }
 0x15d   :  { %2145 = vmatpush1.bf16.msra.mxu1 %v4304_v6 }
 0x15e   :  { %2146 = vmatprep.subr.bf16.mxu1 %v4312_v7  ;;  %v4339_v7 = vld [vmem:[%s5972_s4 + $0xac] ss:$16 sps:$4 sm:$0xff]  }
 0x161   :  { %2147 = vmatpush1.bf16.msra.mxu1 %v4310_v11 }
 0x162   :  { %v3944_v19 = vpop.f32.mrf.mxu0  ;;  %2148 = vmatprep.subr.bf16.mxu1 %v4318_v13  ;;  %v4337_v13 = vld [vmem:[%s5972_s4 + $0xa8] ss:$16 sps:$4 sm:$0xff]  }
 0x164   :  { %v3945_v24 = vpop.f32.mrf.mxu0 }
 0x165   :  { %v3946_v50 = vadd.f32 %v3945_v24, %v3944_v19  ;;  %2149 = vmatpush1.bf16.msra.mxu1 %v4316_v17  ;;  %v4385_v17 = vld [vmem:[%s5974_s6 + $0x50] ss:$8 sps:$4 sm:$0xff]  }
 0x166   :  { %v3947_v27 = vpop.f32.mrf.mxu0  ;;  %2150 = vmatprep.subr.bf16.mxu1 %v4324_v20  ;;  %v4340_v19 = vld [vmem:[%s5972_s4 + $0x88] ss:$16 sps:$4 sm:$0xff]   ;;  %v4345_v20 = vld [vmem:[%s5972_s4 + $0x6c] ss:$16 sps:$4 sm:$0xff]  }
 0x167   :  { %v1349_v35 = vadd.f32 %v3946_v50, %v1300_v63  ;;  %v4391_v24 = vld [vmem:[%s5974_s6 + $0x30] ss:$8 sps:$4 sm:$0xff]   ;;  %v4351_v50 = vld [vmem:[%s5972_s4 + $0x2c] ss:$16 sps:$4 sm:$0xff]  }
 0x168   :  { %v3948_v32 = vpop.f32.mrf.mxu0  ;;  %v4358_v63 = vld [vmem:[%s5972_s4 + $0x1c8] ss:$16 sps:$4 sm:$0xff]  }
 0x169   :  { %v3949_v36 = vadd.f32 %v3948_v32, %v3947_v27  ;;  %2151 = vmatpush1.bf16.msra.mxu1 %v4322_v54  ;;  %v1365_v46 = vmax.f32 %v1349_v35, 0.0  ;;  %v4349_v54 = vld [vmem:[%s5972_s4 + $0x28] ss:$16 sps:$4 sm:$0xff]   ;;  %v4363_v32 = vld [vmem:[%s5972_s4 + $0x1ac] ss:$16 sps:$4 sm:$0xff]  }
 0x16a   :  { %v3950_v14 = vpop.f32.mrf.mxu0  ;;  %2152 = vmatprep.subr.bf16.mxu1 %v4330_v28  ;;  %v4352_v27 = vld [vmem:[%s5972_s4 + $0x8] ss:$16 sps:$4 sm:$0xff]   ;;  %v4357_v28 = vld [vmem:[%s5972_s4 + $0x1ec] ss:$16 sps:$4 sm:$0xff]  }
 0x16b   :  { %v1352_v43 = vadd.f32 %v3949_v36, %v1303_v34  ;;  %v4394_v34 = vld [vmem:[%s5974_s6 + $0x20] ss:$8 sps:$4 sm:$0xff]   ;;  %v4399_v36 = vld [vmem:[%s5974_s6 + $0x14] ss:$8 sps:$4 sm:$0xff]  }
 0x16c   :  { %v3951_v33 = vpop.f32.mrf.mxu0  ;;  %v4361_v35 = vld [vmem:[%s5972_s4 + $0x1a8] ss:$16 sps:$4 sm:$0xff]  }
 0x16d   :  { %v1368_v47 = vmax.f32 %v1352_v43, 0.0  ;;  %v3952_v49 = vadd.f32 %v3951_v33, %v3950_v14  ;;  %2153 = vmatpush1.bf16.msra.mxu1 %v4328_v38  ;;  %v4366_v38 = vld [vmem:[%s5972_s4 + $0x18c] ss:$16 sps:$4 sm:$0xff]   ;;  %v4364_v14 = vld [vmem:[%s5972_s4 + $0x188] ss:$16 sps:$4 sm:$0xff]  }
 0x16e   :  { %v3953_v51 = vpop.f32.mrf.mxu0  ;;  %2611 = vmatprep.subr.bf16.mxu1 %v4381_v3  ;;  %v4402_v3 = vld [vmem:[%s5974_s6 + $0x4] ss:$8 sps:$4 sm:$0xff]   ;;  %v4367_v43 = vld [vmem:[%s5972_s4 + $0x168] ss:$16 sps:$4 sm:$0xff]  }
 0x16f   :  { %v1377_v45 = vpack.c.bf16 %v1368_v47, %v1365_v46  ;;  %v1357_v62 = vadd.f32 %v3952_v49, %v1308_v21  ;;  %v4372_v33 = vld [vmem:[%s5972_s4 + $0x14c] ss:$16 sps:$4 sm:$0xff]   ;;  %v4406_v47 = vld [vmem:[%s5974_s6 + $0xe0] ss:$8 sps:$4 sm:$0xff]   ;;  %v4409_v21 = vld [vmem:[%s5974_s6 + $0xd0] ss:$8 sps:$4 sm:$0xff]  }
 0x170   :  { %v3954_v53 = vpop.f32.mrf.mxu0  ;;  %v4408_v46 = vld [vmem:[%s5974_s6 + $0xe4] ss:$8 sps:$4 sm:$0xff]   ;;  %v4370_v49 = vld [vmem:[%s5972_s4 + $0x148] ss:$16 sps:$4 sm:$0xff]  }
 0x171   :  { %v3955_v1 = vadd.f32 %v3954_v53, %v3953_v51  ;;  %2065 = vmatmul.mubr.bf16.vlgmr.msra.gmra.mxu0 %v1377_v45  ;;  %2171 = vmatmul.mubr.bf16.vlgmr.msra.gmra.mxu1 %v1377_v45  ;;  %v1371_v11 = vmax.f32 %v1357_v62, 0.0  ;;  %v4411_v51 = vld [vmem:[%s5974_s6 + $0xd4] ss:$8 sps:$4 sm:$0xff]   ;;  %v4373_v45 = vld [vmem:[%s5972_s4 + $0x128] ss:$16 sps:$4 sm:$0xff]  }
 0x172   :  { %2086 = vmatpush1.bf16.msra.mxu0 %v4331_v52  ;;  %2074 = vmatprep.mubr.bf16.mxu0 %v4563_v41  ;;  %v4375_v52 = vld [vmem:[%s5972_s4 + $0x12c] ss:$16 sps:$4 sm:$0xff]  }
 0x173   :  { %v1360_v6 = vadd.f32 %v3955_v1, %v1311_v48  ;;  %2087 = vmatprep.subr.bf16.mxu0 %v4336_v29  ;;  %2180 = vmatprep.mubr.bf16.mxu1 %v4563_v41  ;;  %v4387_v41 = vld [vmem:[%s5974_s6 + $0x54] ss:$8 sps:$4 sm:$0xff]   ;;  %v4414_v29 = vld [vmem:[%s5974_s6 + $0xc4] ss:$8 sps:$4 sm:$0xff]   ;;  %v4376_v48 = vld [vmem:[%s5972_s4 + $0x108] ss:$16 sps:$4 sm:$0xff]  }
 0x174   :  { %2612 = vmatpush1.bf16.msra.mxu1 %v4379_v57  ;;  %v4378_v53 = vld [vmem:[%s5972_s4 + $0x10c] ss:$16 sps:$4 sm:$0xff]   ;;  %v4412_v57 = vld [vmem:[%s5974_s6 + $0xc0] ss:$8 sps:$4 sm:$0xff]   ;;  %v4415_v1 = vld [vmem:[%s5974_s6 + $0xb0] ss:$8 sps:$4 sm:$0xff]  }
 0x175   :  { %v1374_v12 = vmax.f32 %v1360_v6, 0.0  ;;  %2613 = vmatprep.subr.bf16.mxu1 %v4384_v4  ;;  %v4417_v62 = vld [vmem:[%s5974_s6 + $0xb4] ss:$8 sps:$4 sm:$0xff]   ;;  %v4420_v4 = vld [vmem:[%s5974_s6 + $0xa4] ss:$8 sps:$4 sm:$0xff]  }
 0x176   :  { %2088 = vmatpush1.bf16.msra.mxu0 %v4334_v5  ;;  %v4418_v5 = vld [vmem:[%s5974_s6 + $0xa0] ss:$8 sps:$4 sm:$0xff]   ;;  %v4423_v6 = vld [vmem:[%s5974_s6 + $0x94] ss:$8 sps:$4 sm:$0xff]  }
 0x177   :  { %2089 = vmatprep.subr.bf16.mxu0 %v4339_v7  ;;  %v1380_v15 = vpack.c.bf16 %v1374_v12, %v1371_v11  ;;  %v4424_v7 = vld [vmem:[%s5974_s6 + $0x80] ss:$8 sps:$4 sm:$0xff]   ;;  %v4427_v11 = vld [vmem:[%s5974_s6 + $0x170] ss:$8 sps:$4 sm:$0xff]  }
 0x178   :  { %2614 = vmatpush1.bf16.msra.mxu1 %v4382_v10  ;;  %v4429_v10 = vld [vmem:[%s5974_s6 + $0x174] ss:$8 sps:$4 sm:$0xff]   ;;  %v4430_v12 = vld [vmem:[%s5974_s6 + $0x160] ss:$8 sps:$4 sm:$0xff]  }
 0x179   :  { %2075 = vmatmul.mubr.bf16.gmra.mxu0 %v1380_v15  ;;  %2181 = vmatmul.mubr.bf16.gmra.mxu1 %v1380_v15  ;;  %v4435_v15 = vld [vmem:[%s5974_s6 + $0x154] ss:$8 sps:$4 sm:$0xff]  }
 0x17a   :  { %2090 = vmatpush1.bf16.msra.mxu0 %v4337_v13  ;;  %2117 = vmatprep.mubr.bf16.mxu0 %v5364_v37  ;;  %v4393_v37 = vld [vmem:[%s5974_s6 + $0x34] ss:$8 sps:$4 sm:$0xff]   ;;  %v4433_v13 = vld [vmem:[%s5974_s6 + $0x150] ss:$8 sps:$4 sm:$0xff]  }
 0x17b   :  { %2091 = vmatprep.subr.bf16.mxu0 %v4342_v16  ;;  %2615 = vmatprep.subr.bf16.mxu1 %v4387_v41  ;;  %v4438_v16 = vld [vmem:[%s5974_s6 + $0x144] ss:$8 sps:$4 sm:$0xff]   ;;  %v4436_v41 = vld [vmem:[%s5974_s6 + $0x140] ss:$8 sps:$4 sm:$0xff]  }
 0x17c   :  { %2616 = vmatpush1.bf16.msra.mxu1 %v4385_v17  ;;  %v4441_v17 = vld [vmem:[%s5974_s6 + $0x134] ss:$8 sps:$4 sm:$0xff]  }
 0x17d   :  { %2617 = vmatprep.subr.bf16.mxu1 %v4390_v18  ;;  %v4439_v18 = vld [vmem:[%s5974_s6 + $0x130] ss:$8 sps:$4 sm:$0xff]  }
 0x17e   :  { %2092 = vmatpush1.bf16.msra.mxu0 %v4340_v19  ;;  %v4444_v19 = vld [vmem:[%s5974_s6 + $0x124] ss:$8 sps:$4 sm:$0xff]  }
 0x17f   :  { %2093 = vmatprep.subr.bf16.mxu0 %v4345_v20  ;;  %v4442_v20 = vld [vmem:[%s5974_s6 + $0x120] ss:$8 sps:$4 sm:$0xff]  }
 0x180   :  { %2618 = vmatpush1.bf16.msra.mxu1 %v4388_v22  ;;  %v4447_v22 = vld [vmem:[%s5974_s6 + $0x114] ss:$8 sps:$4 sm:$0xff]  }
 0x181   :  { %2619 = vmatprep.subr.bf16.mxu1 %v4393_v37  ;;  %v4445_v37 = vld [vmem:[%s5974_s6 + $0x110] ss:$8 sps:$4 sm:$0xff]  }
 0x182   :  { %2094 = vmatpush1.bf16.msra.mxu0 %v4343_v23  ;;  %v4450_v23 = vld [vmem:[%s5974_s6 + $0x104] ss:$8 sps:$4 sm:$0xff]  }
 0x183   :  { %2095 = vmatprep.subr.bf16.mxu0 %v4348_v60  ;;  %v4448_v60 = vld [vmem:[%s5974_s6 + $0x100] ss:$8 sps:$4 sm:$0xff]  }
 0x184   :  { %2620 = vmatpush1.bf16.msra.mxu1 %v4391_v24  ;;  %v4453_v24 = vld [vmem:[%s5974_s6 + $0x1f4] ss:$8 sps:$4 sm:$0xff]  }
 0x185   :  { %2621 = vmatprep.subr.bf16.mxu1 %v4396_v31  ;;  %v4468_v31 = vld [vmem:[%s5974_s6 + $0x1a4] ss:$8 sps:$4 sm:$0xff]  }
 0x186   :  { %2096 = vmatpush1.bf16.msra.mxu0 %v4346_v25  ;;  %v4451_v25 = vld [vmem:[%s5974_s6 + $0x1f0] ss:$8 sps:$4 sm:$0xff]  }
 0x187   :  { %2097 = vmatprep.subr.bf16.mxu0 %v4351_v50  ;;  %v4456_v50 = vld [vmem:[%s5974_s6 + $0x1e4] ss:$8 sps:$4 sm:$0xff]  }
 0x188   :  { %2622 = vmatpush1.bf16.msra.mxu1 %v4394_v34  ;;  %v4471_v34 = vld [vmem:[%s5974_s6 + $0x194] ss:$8 sps:$4 sm:$0xff]  }
 0x189   :  { %2623 = vmatprep.subr.bf16.mxu1 %v4399_v36  ;;  %v4474_v36 = vld [vmem:[%s5974_s6 + $0x184] ss:$8 sps:$4 sm:$0xff]  }
 0x18a   :  { %2098 = vmatpush1.bf16.msra.mxu0 %v4349_v54  ;;  %v4454_v54 = vld [vmem:[%s5974_s6 + $0x1e0] ss:$8 sps:$4 sm:$0xff]  }
 0x18b   :  { %2099 = vmatprep.subr.bf16.mxu0 %v4354_v26  ;;  %v4459_v26 = vld [vmem:[%s5974_s6 + $0x1d4] ss:$8 sps:$4 sm:$0xff]  }
 0x18c   :  { %2624 = vmatpush1.bf16.msra.mxu1 %v4397_v39 }
 0x18d   :  { %2625 = vmatprep.subr.bf16.mxu1 %v4402_v3 }
 0x18e   :  { %2100 = vmatpush1.bf16.msra.mxu0 %v4352_v27  ;;  %v4457_v27 = vld [vmem:[%s5974_s6 + $0x1d0] ss:$8 sps:$4 sm:$0xff]  }
 0x18f   :  { %2101 = vmatprep.subr.bf16.mxu0 %v4357_v28  ;;  %v4462_v28 = vld [vmem:[%s5974_s6 + $0x1c4] ss:$8 sps:$4 sm:$0xff]  }
 0x190   :  { %2626 = vmatpush1.bf16.msra.mxu1 %v4400_v42  ;;  %v1477_v42 = vld [vmem:[%s5975_s5] sm:$0xf] }
 0x191   :  { %2627 = vmatprep.subr.bf16.mxu1 %v4405_v55  ;;  %v1486_v55 = vrot.slane %v1477_v42, %v5334_v59 }
 0x192   :  { %2102 = vmatpush2.bf16.msra.mxu0 %v4355_v30  ;;  %v4460_v30 = vld [vmem:[%s5974_s6 + $0x1c0] ss:$8 sps:$4 sm:$0xff]  }
 0x193   :  { %2103 = vmatprep.subr.bf16.mxu0 %v4360_v58  ;;  %v4465_v58 = vld [vmem:[%s5974_s6 + $0x1b4] ss:$8 sps:$4 sm:$0xff]  }
 0x194   :  { %2628 = vmatpush2.bf16.msra.mxu1 %v4403_v44 }
 0x195   :  { %2629 = vmatprep.subr.bf16.mxu1 %v4408_v46 }
 0x196   :  { %2104 = vmatpush2.bf16.msra.mxu0 %v4358_v63  ;;  %v4463_v63 = vld [vmem:[%s5974_s6 + $0x1b0] ss:$8 sps:$4 sm:$0xff]  }
 0x197   :  { %2105 = vmatprep.subr.bf16.mxu0 %v4363_v32  ;;  %v4466_v32 = vld [vmem:[%s5974_s6 + $0x1a0] ss:$8 sps:$4 sm:$0xff]  }
 0x198   :  { %2630 = vmatpush2.bf16.msra.mxu1 %v4406_v47 }
 0x199   :  { %2631 = vmatprep.subr.bf16.mxu1 %v4411_v51 }
 0x19a   :  { %2106 = vmatpush2.bf16.msra.mxu0 %v4361_v35  ;;  %v4469_v35 = vld [vmem:[%s5974_s6 + $0x190] ss:$8 sps:$4 sm:$0xff]  }
 0x19b   :  { %2107 = vmatprep.subr.bf16.mxu0 %v4366_v38  ;;  %v4472_v38 = vld [vmem:[%s5974_s6 + $0x180] ss:$8 sps:$4 sm:$0xff]  }
 0x19c   :  { %2632 = vmatpush2.bf16.msra.mxu1 %v4409_v21 }
 0x19d   :  { %2633 = vmatprep.subr.bf16.mxu1 %v4414_v29 }
 0x19e   :  { %2108 = vmatpush2.bf16.msra.mxu0 %v4364_v14 }
 0x19f   :  { %2109 = vmatprep.subr.bf16.mxu0 %v4369_v9 }
 0x1a0   :  { %2634 = vmatpush2.bf16.msra.mxu1 %v4412_v57 }
 0x1a1   :  { %2635 = vmatprep.subr.bf16.mxu1 %v4417_v62 }
 0x1a2   :  { %2110 = vmatpush2.bf16.msra.mxu0 %v4367_v43 }
 0x1a3   :  { %2111 = vmatprep.subr.bf16.mxu0 %v4372_v33  ;;  %v1482_v33 = vrot.slane %v1477_v42, %v5342_v61 }
 0x1a4   :  { %2636 = vmatpush2.bf16.msra.mxu1 %v4415_v1 }
 0x1a5   :  { %2637 = vmatprep.subr.bf16.mxu1 %v4420_v4 }
 0x1a6   :  { %2112 = vmatpush2.bf16.msra.mxu0 %v4370_v49 }
 0x1a7   :  { %2113 = vmatprep.subr.bf16.mxu0 %v4375_v52 }
 0x1a8   :  { %2638 = vmatpush2.bf16.msra.mxu1 %v4418_v5 }
 0x1a9   :  { %2639 = vmatprep.subr.bf16.mxu1 %v4423_v6 }
 0x1aa   :  { %2114 = vmatpush2.bf16.msra.mxu0 %v4373_v45 }
 0x1ab   :  { %2115 = vmatprep.subr.bf16.mxu0 %v4378_v53 }
 0x1ae   :  { %2116 = vmatpush2.bf16.msra.mxu0 %v4376_v48 }
 0x1af   :  { %2664 = vmatprep.subr.bf16.mxu0 %v4429_v10 }
 0x1b1   :  { %2118 = vmatmul.mubr.bf16.vlgmr.msra.gmra.mxu0 %v5366_v40  ;;  %v4421_v40 = vld [vmem:[%s5974_s6 + $0x90] ss:$8 sps:$4 sm:$0xff]  }
 0x1b2   :  { %2127 = vmatprep.mubr.bf16.mxu0 %v5376_v0  ;;  %2640 = vmatpush2.bf16.msra.mxu1 %v4421_v40  ;;  %v4426_v0 = vld [vmem:[%s5974_s6 + $0x84] ss:$8 sps:$4 sm:$0xff]  }
 0x1b3   :  { %2641 = vmatprep.subr.bf16.mxu1 %v4426_v0  ;;  %2665 = vmatpush1.bf16.msra.mxu0 %v4427_v11 }
 0x1b6   :  { %2642 = vmatpush2.bf16.msra.mxu1 %v4424_v7 }
 0x1b9   :  { %2128 = vmatmul.mubr.bf16.gmra.mxu0 %v5381_v2  ;;  %v4432_v2 = vld [vmem:[%s5974_s6 + $0x164] ss:$8 sps:$4 sm:$0xff]  }
 0x1ba   :  { %2666 = vmatprep.subr.bf16.mxu0 %v4432_v2 }
 0x1bb   :  { %2667 = vmatpush1.bf16.msra.mxu0 %v4430_v12 }
 0x1bc   :  { %2668 = vmatprep.subr.bf16.mxu0 %v4435_v15 }
 0x1bf   :  { %2669 = vmatpush1.bf16.msra.mxu0 %v4433_v13 }
 0x1c0   :  { %2670 = vmatprep.subr.bf16.mxu0 %v4438_v16 }
 0x1c3   :  { %2671 = vmatpush1.bf16.msra.mxu0 %v4436_v41 }
 0x1c4   :  { %2672 = vmatprep.subr.bf16.mxu0 %v4441_v17 }
 0x1c7   :  { %2673 = vmatpush1.bf16.msra.mxu0 %v4439_v18 }
 0x1c8   :  { %2674 = vmatprep.subr.bf16.mxu0 %v4444_v19 }
 0x1cb   :  { %2675 = vmatpush1.bf16.msra.mxu0 %v4442_v20 }
 0x1cc   :  { %2676 = vmatprep.subr.bf16.mxu0 %v4447_v22 }
 0x1cf   :  { %2677 = vmatpush1.bf16.msra.mxu0 %v4445_v37 }
 0x1d0   :  { %2678 = vmatprep.subr.bf16.mxu0 %v4450_v23 }
 0x1d3   :  { %2679 = vmatpush1.bf16.msra.mxu0 %v4448_v60 }
 0x1d4   :  { %2680 = vmatprep.subr.bf16.mxu0 %v4453_v24 }
 0x1d7   :  { %2681 = vmatpush2.bf16.msra.mxu0 %v4451_v25 }
 0x1d8   :  { %2682 = vmatprep.subr.bf16.mxu0 %v4456_v50 }
 0x1db   :  { %2683 = vmatpush2.bf16.msra.mxu0 %v4454_v54 }
 0x1dc   :  { %2684 = vmatprep.subr.bf16.mxu0 %v4459_v26 }
 0x1df   :  { %2685 = vmatpush2.bf16.msra.mxu0 %v4457_v27  ;;  %v1493_v27 = vsub.s32 3, %v5329_v56 }
 0x1e0   :  { %2686 = vmatprep.subr.bf16.mxu0 %v4462_v28 }
 0x1e3   :  { %2687 = vmatpush2.bf16.msra.mxu0 %v4460_v30  ;;  %v1494_v30 = vrot.slane %v1477_v42, %v1493_v27  ;;  %v4495_v27 = vld [vmem:[%s5976_s8 + $0x1c] ss:$12 sps:$4 sm:$0xff]  }
 0x1e4   :  { %2688 = vmatprep.subr.bf16.mxu0 %v4465_v58 }
 0x1e7   :  { %2689 = vmatpush2.bf16.msra.mxu0 %v4463_v63  ;;  %v1490_v63 = vrot.slane %v1477_v42, %v5396_v8 }
 0x1e8   :  { %2690 = vmatprep.subr.bf16.mxu0 %v4468_v31 }
 0x1eb   :  { %2691 = vmatpush2.bf16.msra.mxu0 %v4466_v32 }
 0x1ec   :  { %2692 = vmatprep.subr.bf16.mxu0 %v4471_v34 }
 0x1ef   :  { %2693 = vmatpush2.bf16.msra.mxu0 %v4469_v35 }
 0x1f0   :  { %2694 = vmatprep.subr.bf16.mxu0 %v4474_v36 }
 0x1f3   :  { %2695 = vmatpush2.bf16.msra.mxu0 %v4472_v38 }
 0x210   :  { %v2013_v39 = vpop.f32.mrf.mxu1 }
 0x211   :  { %v2014_v52 = vadd.f32 %v2013_v39, %v1482_v33 }
 0x212   :  { %v2015_v14 = vpop.f32.mrf.mxu1 }
 0x213   :  { %v2016_v49 = vadd.f32 %v2015_v14, %v1486_v55 }
 0x214   :  { %v2017_v3 = vpop.f32.mrf.mxu1 }
 0x215   :  { %v2018_v51 = vadd.f32 %v2017_v3, %v1482_v33 }
 0x216   :  { %v2019_v9 = vpop.f32.mrf.mxu1 }
 0x217   :  { %v2020_v45 = vadd.f32 %v2019_v9, %v1486_v55 }
 0x218   :  { %v2023_v43 = vpop.f32.mrf.mxu1 }
 0x219   :  { %v2024_v13 = vadd.f32 %v2023_v43, %v1482_v33 }
 0x21a   :  { %v2025_v46 = vpop.f32.mrf.mxu1 }
 0x21b   :  { %v2026_v11 = vadd.f32 %v2025_v46, %v1486_v55 }
 0x21c   :  { %v2027_v57 = vpop.f32.mrf.mxu1 }
 0x21d   :  { %v2028_v2 = vadd.f32 %v2027_v57, %v1482_v33 }
 0x21e   :  { %v2029_v0 = vpop.f32.mrf.mxu1 }
 0x21f   :  { %v2030_v41 = vadd.f32 %v2029_v0, %v1486_v55 }
 0x231   :  { %v2066_v44 = vpop.f32.mrf.mxu0  ;;  %v2172_v54 = vpop.f32.mrf.mxu1 }
 0x232   :  { %v2067_v48 = vadd.f32 %v2066_v44, %v2014_v52 }
 0x233   :  { %v2068_v47 = vpop.f32.mrf.mxu0  ;;  %v2174_v26 = vpop.f32.mrf.mxu1 }
 0x234   :  { %v2069_v29 = vadd.f32 %v2068_v47, %v2016_v49  ;;  %v2191_v7 = vmax.f32 %v2067_v48, 0.0 }
 0x235   :  { %v2070_v21 = vpop.f32.mrf.mxu0  ;;  %v2176_v28 = vpop.f32.mrf.mxu1 }
 0x236   :  { %v2071_v53 = vadd.f32 %v2070_v21, %v2018_v51  ;;  %v2192_v6 = vmax.f32 %v2069_v29, 0.0 }
 0x237   :  { %v2072_v62 = vpop.f32.mrf.mxu0  ;;  %v2178_v58 = vpop.f32.mrf.mxu1 }
 0x238   :  { %v2073_v1 = vadd.f32 %v2072_v62, %v2020_v45  ;;  %v2195_v4 = vmax.f32 %v2071_v53, 0.0 }
 0x239   :  { %v2076_v5 = vpop.f32.mrf.mxu0  ;;  %v2182_v35 = vpop.f32.mrf.mxu1 }
 0x23a   :  { %v2196_v40 = vmax.f32 %v2073_v1, 0.0  ;;  %v2207_v15 = vpack.c.bf16 %v2195_v4, %v2191_v7  ;;  %v2077_v19 = vadd.f32 %v2076_v5, %v2024_v13 }
 0x23b   :  { %v2078_v10 = vpop.f32.mrf.mxu0  ;;  %v2184_v55 = vpop.f32.mrf.mxu1 }
 0x23c   :  { %v2208_v12 = vpack.c.bf16 %v2196_v40, %v2192_v6  ;;  %v2079_v17 = vadd.f32 %v2078_v10, %v2026_v11  ;;  %v2199_v24 = vmax.f32 %v2077_v19, 0.0  ;;  %v4481_v19 = vld [vmem:[%s5976_s8 + $0x78] ss:$12 sps:$4 sm:$0xff]  }
 0x23d   :  { %v2080_v16 = vpop.f32.mrf.mxu0  ;;  %v2186_v52 = vpop.f32.mrf.mxu1 }
 0x23e   :  { %v2081_v18 = vadd.f32 %v2080_v16, %v2028_v2  ;;  %2643 = vmatprep.mubr.bf16.mxu1 %v2208_v12  ;;  %v2200_v23 = vmax.f32 %v2079_v17, 0.0  ;;  %v4475_v16 = vld [vmem:[%s5976_s8 + $0xa8] ss:$12 sps:$4 sm:$0xff]   ;;  %v4478_v17 = vld [vmem:[%s5976_s8 + $0x90] ss:$12 sps:$4 sm:$0xff]  }
 0x23f   :  { %v2082_v20 = vpop.f32.mrf.mxu0  ;;  %2644 = vmatmul.mubr.bf16.vlgmr.msra.gmra.mxu1 %v2207_v15  ;;  %v2188_v6 = vpop.f32.mrf.mxu1  ;;  %v4477_v15 = vld [vmem:[%s5976_s8 + $0xac] ss:$12 sps:$4 sm:$0xff]  }
 0x240   :  { %v2083_v22 = vadd.f32 %v2082_v20, %v2030_v41  ;;  %v2203_v37 = vmax.f32 %v2081_v18, 0.0  ;;  %3066 = vmatprep.subr.bf16.mxu1 %v4477_v15  ;;  %v4480_v41 = vld [vmem:[%s5976_s8 + $0x94] ss:$12 sps:$4 sm:$0xff]   ;;  %v4483_v18 = vld [vmem:[%s5976_s8 + $0x7c] ss:$12 sps:$4 sm:$0xff]  }
 0x241   :  { %3067 = vmatpush1.bf16.msra.mxu1 %v4475_v16  ;;  %v4486_v20 = vld [vmem:[%s5976_s8 + $0x64] ss:$12 sps:$4 sm:$0xff]  }
 0x242   :  { %v2204_v60 = vmax.f32 %v2083_v22, 0.0  ;;  %v2211_v50 = vpack.c.bf16 %v2203_v37, %v2199_v24  ;;  %3068 = vmatprep.subr.bf16.mxu1 %v4480_v41  ;;  %v4484_v22 = vld [vmem:[%s5976_s8 + $0x60] ss:$12 sps:$4 sm:$0xff]   ;;  %v4487_v24 = vld [vmem:[%s5976_s8 + $0x48] ss:$12 sps:$4 sm:$0xff]  }
 0x243   :  { %v4489_v37 = vld [vmem:[%s5976_s8 + $0x4c] ss:$12 sps:$4 sm:$0xff]  }
 0x244   :  { %v2212_v25 = vpack.c.bf16 %v2204_v60, %v2200_v23  ;;  %v4502_v23 = vld [vmem:[%s5976_s8 + $0x170] ss:$12 sps:$4 sm:$0xff]  }
 0x245   :  { %3069 = vmatpush1.bf16.msra.mxu1 %v4478_v17  ;;  %v4503_v60 = vld [vmem:[%s5976_s8 + $0xb0] ss:$12 sps:$4 sm:$0xff]   ;;  %3956 = vmatprep.subr.bf16.mxu0 %v4502_v23 }
 0x246   :  { %2653 = vmatprep.mubr.bf16.mxu1 %v2212_v25  ;;  %3070 = vmatprep.subr.bf16.mxu1 %v4483_v18  ;;  %v4492_v25 = vld [vmem:[%s5976_s8 + $0x34] ss:$12 sps:$4 sm:$0xff]  }
 0x247   :  { %2654 = vmatmul.mubr.bf16.gmra.mxu1 %v2211_v50  ;;  %v4507_v50 = vld [vmem:[%s5976_s8 + $0x158] ss:$12 sps:$4 sm:$0xff]  }
 0x249   :  { %3071 = vmatpush1.bf16.msra.mxu1 %v4481_v19 }
 0x24a   :  { %3072 = vmatprep.subr.bf16.mxu1 %v4486_v20 }
 0x24d   :  { %3073 = vmatpush1.bf16.msra.mxu1 %v4484_v22 }
 0x24e   :  { %3074 = vmatprep.subr.bf16.mxu1 %v4489_v37 }
 0x251   :  { %3075 = vmatpush1.bf16.msra.mxu1 %v4487_v24 }
 0x252   :  { %3076 = vmatprep.subr.bf16.mxu1 %v4492_v25 }
 0x271   :  { %v2119_v31 = vpop.f32.mrf.mxu0 }
 0x272   :  { %v2120_v36 = vadd.f32 %v2119_v31, %v1490_v63  ;;  %v4518_v31 = vld [vmem:[%s5976_s8 + $0x68] ss:$12 sps:$4 sm:$0xff]  }
 0x273   :  { %v2121_v32 = vpop.f32.mrf.mxu0 }
 0x274   :  { %v2122_v34 = vadd.f32 %v2121_v32, %v1494_v30  ;;  %v2173_v33 = vadd.f32 %v2172_v54, %v2120_v36  ;;  %v4508_v54 = vld [vmem:[%s5976_s8 + $0x98] ss:$12 sps:$4 sm:$0xff]   ;;  %v4522_v36 = vld [vmem:[%s5976_s8 + $0x110] ss:$12 sps:$4 sm:$0xff]  }
 0x275   :  { %v2123_v38 = vpop.f32.mrf.mxu0  ;;  %v4498_v32 = vld [vmem:[%s5976_s8 + $0x4] ss:$12 sps:$4 sm:$0xff]  }
 0x276   :  { %v2124_v39 = vadd.f32 %v2123_v38, %v1490_v63  ;;  %v2175_v3 = vadd.f32 %v2174_v26, %v2122_v34  ;;  %v2193_v21 = vmax.f32 %v2173_v33, 0.0  ;;  %v4490_v26 = vld [vmem:[%s5976_s8 + $0x30] ss:$12 sps:$4 sm:$0xff]   ;;  %v4496_v34 = vld [vmem:[%s5976_s8] ss:$12 sps:$4 sm:$0xff]  }
 0x277   :  { %v2125_v14 = vpop.f32.mrf.mxu0  ;;  %3077 = vmatpush1.bf16.msra.mxu1 %v4490_v26  ;;  %v4523_v38 = vld [vmem:[%s5976_s8 + $0x50] ss:$12 sps:$4 sm:$0xff]   ;;  %v4514_v33 = vld [vmem:[%s5976_s8 + $0x120] ss:$12 sps:$4 sm:$0xff]  }
 0x278   :  { %v2177_v9 = vadd.f32 %v2176_v28, %v2124_v39  ;;  %v2126_v43 = vadd.f32 %v2125_v14, %v1494_v30  ;;  %v2194_v49 = vmax.f32 %v2175_v3, 0.0  ;;  %v4512_v28 = vld [vmem:[%s5976_s8 + $0x140] ss:$12 sps:$4 sm:$0xff]   ;;  %3078 = vmatprep.subr.bf16.mxu1 %v4495_v27  ;;  %v4499_v39 = vld [vmem:[%s5976_s8 + $0x168] ss:$12 sps:$4 sm:$0xff]  }
 0x279   :  { %v2129_v44 = vpop.f32.mrf.mxu0  ;;  %v4506_v14 = vld [vmem:[%s5976_s8 + $0x154] ss:$12 sps:$4 sm:$0xff]   ;;  %v4504_v3 = vld [vmem:[%s5976_s8 + $0x150] ss:$12 sps:$4 sm:$0xff]  }
 0x27a   :  { %v2179_v56 = vadd.f32 %v2178_v58, %v2126_v43  ;;  %v2197_v46 = vmax.f32 %v2177_v9, 0.0  ;;  %v2130_v45 = vadd.f32 %v2129_v44, %v1490_v63  ;;  %v4493_v58 = vld [vmem:[%s5976_s8 + $0x18] ss:$12 sps:$4 sm:$0xff]   ;;  %v4511_v9 = vld [vmem:[%s5976_s8 + $0x13c] ss:$12 sps:$4 sm:$0xff]  }
 0x27b   :  { %v2131_v47 = vpop.f32.mrf.mxu0  ;;  %3079 = vmatpush1.bf16.msra.mxu1 %v4493_v58  ;;  %v4509_v43 = vld [vmem:[%s5976_s8 + $0x138] ss:$12 sps:$4 sm:$0xff]  }
 0x27c   :  { %v2198_v51 = vmax.f32 %v2179_v56, 0.0  ;;  %v2132_v42 = vadd.f32 %v2131_v47, %v1494_v30  ;;  %v2209_v48 = vpack.c.bf16 %v2197_v46, %v2193_v21  ;;  %v2183_v40 = vadd.f32 %v2182_v35, %v2130_v45  ;;  %v4501_v35 = vld [vmem:[%s5976_s8 + $0x16c] ss:$12 sps:$4 sm:$0xff]   ;;  %3080 = vmatprep.subr.bf16.mxu1 %v4498_v32  ;;  %v4519_v56 = vld [vmem:[%s5976_s8 + $0x108] ss:$12 sps:$4 sm:$0xff]  }
 0x27d   :  { %v2133_v29 = vpop.f32.mrf.mxu0  ;;  %v4521_v44 = vld [vmem:[%s5976_s8 + $0x10c] ss:$12 sps:$4 sm:$0xff]   ;;  %v4526_v46 = vld [vmem:[%s5976_s8 + $0xf4] ss:$12 sps:$4 sm:$0xff]  }
 0x27e   :  { %v2134_v53 = vadd.f32 %v2133_v29, %v1490_v63  ;;  %v2210_v57 = vpack.c.bf16 %v2198_v51, %v2194_v49  ;;  %v2185_v1 = vadd.f32 %v2184_v55, %v2132_v42  ;;  %v2201_v2 = vmax.f32 %v2183_v40, 0.0  ;;  %v4517_v63 = vld [vmem:[%s5976_s8 + $0x128] ss:$12 sps:$4 sm:$0xff]   ;;  %v4516_v55 = vld [vmem:[%s5976_s8 + $0x124] ss:$12 sps:$4 sm:$0xff]  }
 0x27f   :  { %v2135_v62 = vpop.f32.mrf.mxu0  ;;  %3081 = vmatpush1.bf16.msra.mxu1 %v4496_v34  ;;  %v4527_v47 = vld [vmem:[%s5976_s8 + $0xf8] ss:$12 sps:$4 sm:$0xff]   ;;  %v4524_v49 = vld [vmem:[%s5976_s8 + $0xf0] ss:$12 sps:$4 sm:$0xff]   ;;  %v4533_v45 = vld [vmem:[%s5976_s8 + $0x20] ss:$12 sps:$4 sm:$0xff]  }
 0x280   :  { %v2187_v4 = vadd.f32 %v2186_v52, %v2134_v53  ;;  %v2136_v5 = vadd.f32 %v2135_v62, %v1494_v30  ;;  %2696 = vmatprep.mubr.bf16.mxu0 %v2210_v57  ;;  %v2202_v10 = vmax.f32 %v2185_v1, 0.0  ;;  %v4513_v30 = vld [vmem:[%s5976_s8 + $0x80] ss:$12 sps:$4 sm:$0xff]   ;;  %3082 = vmatprep.subr.bf16.mxu1 %v4501_v35  ;;  %v4528_v51 = vld [vmem:[%s5976_s8 + $0x38] ss:$12 sps:$4 sm:$0xff]  }
 0x281   :  { %2697 = vmatmul.mubr.bf16.vlgmr.msra.gmra.mxu0 %v2209_v48  ;;  %v4531_v42 = vld [vmem:[%s5976_s8 + $0xdc] ss:$12 sps:$4 sm:$0xff]   ;;  %v4532_v52 = vld [vmem:[%s5976_s8 + $0xe0] ss:$12 sps:$4 sm:$0xff]   ;;  %v4529_v21 = vld [vmem:[%s5976_s8 + $0xd8] ss:$12 sps:$4 sm:$0xff]  }
 0x282   :  { %v2189_v0 = vadd.f32 %v2188_v6, %v2136_v5  ;;  %v2205_v7 = vmax.f32 %v2187_v4, 0.0  ;;  %3957 = vmatpush3.bf16.msra.mxu0 %v4503_v60  ;;  %v4536_v29 = vld [vmem:[%s5976_s8 + $0xc4] ss:$12 sps:$4 sm:$0xff]   ;;  %v4537_v53 = vld [vmem:[%s5976_s8 + $0xc8] ss:$12 sps:$4 sm:$0xff]   ;;  %v4539_v62 = vld [vmem:[%s5977_s10 + $0x78] sm:$0xff]  }
 0x283   :  { %3958 = vmatprep.subr.bf16.mxu0 %v4507_v50  ;;  %3083 = vmatpush2.bf16.msra.mxu1 %v4499_v39  ;;  %v4534_v57 = vld [vmem:[%s5976_s8 + $0xc0] ss:$12 sps:$4 sm:$0xff]   ;;  %v4538_v48 = vld [vmem:[%s5976_s8 + $0x8] ss:$12 sps:$4 sm:$0xff]   ;;  %v4545_v1 = vld [vmem:[%s5977_s10 + $0xb8] sm:$0xff]  }
 0x284   :  { %v2206_v11 = vmax.f32 %v2189_v0, 0.0  ;;  %v2213_v13 = vpack.c.bf16 %v2205_v7, %v2201_v2  ;;  %3084 = vmatprep.subr.bf16.mxu1 %v4506_v14  ;;  %v2279_v0 = vld [vmem:[%s5978_s7] sm:$0x3] }
 0x286   :  { %v2214_v12 = vpack.c.bf16 %v2206_v11, %v2202_v10  ;;  %3959 = vmatpush3.bf16.msra.mxu0 %v4508_v54  ;;  %v2288_v10 = vrot.slane %v2279_v0, %v5334_v59  ;;  %v2284_v11 = vrot.slane %v2279_v0, %v5342_v61  ;;  %v4559_v0 = vld [vmem:[%s5977_s10] sm:$0xff]  }
 0x287   :  { %3960 = vmatprep.subr.bf16.mxu0 %v4512_v28  ;;  %3085 = vmatpush2.bf16.msra.mxu1 %v4504_v3 }
 0x288   :  { %2706 = vmatprep.mubr.bf16.mxu0 %v2214_v12  ;;  %3086 = vmatprep.subr.bf16.mxu1 %v4511_v9 }
 0x289   :  { %2707 = vmatmul.mubr.bf16.gmra.mxu0 %v2213_v13 }
 0x28a   :  { %3961 = vmatpush3.bf16.msra.mxu0 %v4513_v30 }
 0x28b   :  { %3962 = vmatprep.subr.bf16.mxu0 %v4517_v63  ;;  %3087 = vmatpush2.bf16.msra.mxu1 %v4509_v43 }
 0x28c   :  { %3088 = vmatprep.subr.bf16.mxu1 %v4516_v55 }
 0x28e   :  { %3963 = vmatpush3.bf16.msra.mxu0 %v4518_v31  ;;  %v4540_v31 = vld [vmem:[%s5977_s10 + $0x38] sm:$0xff]  }
 0x28f   :  { %3964 = vmatprep.subr.bf16.mxu0 %v4522_v36  ;;  %3089 = vmatpush2.bf16.msra.mxu1 %v4514_v33  ;;  %v4541_v36 = vld [vmem:[%s5977_s10 + $0x70] sm:$0xff]  }
 0x290   :  { %3090 = vmatprep.subr.bf16.mxu1 %v4521_v44  ;;  %v4542_v33 = vld [vmem:[%s5977_s10 + $0x30] sm:$0xff]  }
 0x292   :  { %3965 = vmatpush3.bf16.msra.mxu0 %v4523_v38  ;;  %v4548_v38 = vld [vmem:[%s5977_s10 + $0xb0] sm:$0xff]  }
 0x293   :  { %3091 = vmatpush2.bf16.msra.mxu1 %v4519_v56  ;;  %3966 = vmatprep.subr.bf16.mxu0 %v4527_v47  ;;  %v4543_v56 = vld [vmem:[%s5977_s10 + $0x68] sm:$0xff]  }
 0x294   :  { %3092 = vmatprep.subr.bf16.mxu1 %v4526_v46  ;;  %v4551_v46 = vld [vmem:[%s5977_s10 + $0xa8] sm:$0xff]  }
 0x296   :  { %3967 = vmatpush3.bf16.msra.mxu0 %v4528_v51 }
 0x297   :  { %3093 = vmatpush2.bf16.msra.mxu1 %v4524_v49  ;;  %3968 = vmatprep.subr.bf16.mxu0 %v4532_v52  ;;  %v4544_v52 = vld [vmem:[%s5977_s10 + $0x28] sm:$0xff]  }
 0x298   :  { %3094 = vmatprep.subr.bf16.mxu1 %v4531_v42 }
 0x29a   :  { %3969 = vmatpush3.bf16.msra.mxu0 %v4533_v45  ;;  %v4546_v45 = vld [vmem:[%s5977_s10 + $0x60] sm:$0xff]  }
 0x29b   :  { %3095 = vmatpush2.bf16.msra.mxu1 %v4529_v21  ;;  %3970 = vmatprep.subr.bf16.mxu0 %v4537_v53  ;;  %v4549_v53 = vld [vmem:[%s5977_s10 + $0x58] sm:$0xff]  }
 0x29c   :  { %3096 = vmatprep.subr.bf16.mxu1 %v4536_v29  ;;  %v4547_v29 = vld [vmem:[%s5977_s10 + $0x20] sm:$0xff]  }
 0x29e   :  { %3971 = vmatpush3.bf16.msra.mxu0 %v4538_v48  ;;  %v4552_v48 = vld [vmem:[%s5977_s10 + $0x50] sm:$0xff]  }
 0x29f   :  { %3097 = vmatpush2.bf16.msra.mxu1 %v4534_v57  ;;  %3984 = vmatprep.subr.bf16.mxu0 %v4539_v62  ;;  %v4550_v57 = vld [vmem:[%s5977_s10 + $0x18] sm:$0xff]   ;;  %v4553_v62 = vld [vmem:[%s5977_s10 + $0x10] sm:$0xff]  }
 0x2a0   :  { %4022 = vmatprep.subr.bf16.mxu1 %v4545_v1 }
 0x2ff   :  { %v2645_v4 = vpop.f32.mrf.mxu1 }
 0x300   :  { %v2646_v41 = vadd.f32 %v2645_v4, %v2284_v11  ;;  %v4555_v4 = vld [vmem:[%s5977_s10 + $0x48] sm:$0xff]  }
 0x301   :  { %v2647_v5 = vpop.f32.mrf.mxu1 }
 0x302   :  { %v2648_v15 = vadd.f32 %v2647_v5, %v2288_v10  ;;  %v4556_v5 = vld [vmem:[%s5977_s10 + $0x8] sm:$0xff]  }
 0x303   :  { %v2649_v6 = vpop.f32.mrf.mxu1 }
 0x304   :  { %v2650_v16 = vadd.f32 %v2649_v6, %v2284_v11  ;;  %v4557_v6 = vld [vmem:[%s5977_s10 + $0x98] sm:$0xff]  }
 0x305   :  { %v2651_v40 = vpop.f32.mrf.mxu1 }
 0x306   :  { %v2652_v18 = vadd.f32 %v2651_v40, %v2288_v10  ;;  %v4558_v40 = vld [vmem:[%s5977_s10 + $0x40] sm:$0xff]  }
 0x307   :  { %v2655_v7 = vpop.f32.mrf.mxu1 }
 0x308   :  { %v2656_v32 = vadd.f32 %v2655_v7, %v2284_v11  ;;  %v4560_v7 = vld [vmem:[%s5977_s10 + $0x90] sm:$0xff]  }
 0x309   :  { %v2657_v12 = vpop.f32.mrf.mxu1 }
 0x30a   :  { %v2658_v30 = vadd.f32 %v2657_v12, %v2288_v10 }
 0x30b   :  { %v2659_v22 = vpop.f32.mrf.mxu1 }
 0x30c   :  { %v2660_v58 = vadd.f32 %v2659_v22, %v2284_v11  ;;  %v4562_v11 = vld [vmem:[%s5977_s10 + $0x80] sm:$0xff]  }
 0x30d   :  { %v2661_v26 = vpop.f32.mrf.mxu1 }
 0x30e   :  { %v2662_v39 = vadd.f32 %v2661_v26, %v2288_v10  ;;  %v4561_v10 = vld [vmem:[%s5977_s10 + $0x88] sm:$0xff]  }
 0x341   :  { %v2698_v2 = vpop.f32.mrf.mxu0 }
 0x342   :  { %v2699_v37 = vadd.f32 %v2698_v2, %v2646_v41  ;;  %v2793_v2 = vld [vmem:[%s5979_s9] sm:$0x7] }
 0x343   :  { %v2700_v13 = vpop.f32.mrf.mxu0 }
 0x344   :  { %v2701_v19 = vadd.f32 %v2700_v13, %v2648_v15  ;;  %v2717_v27 = vmax.f32 %v2699_v37, 0.0  ;;  %v2802_v15 = vrot.slane %v2793_v2, %v5334_v59 }
 0x345   :  { %v2702_v17 = vpop.f32.mrf.mxu0 }
 0x346   :  { %v2703_v20 = vadd.f32 %v2702_v17, %v2650_v16  ;;  %v2718_v50 = vmax.f32 %v2701_v19, 0.0  ;;  %v2798_v16 = vrot.slane %v2793_v2, %v5342_v61 }
 0x347   :  { %v2704_v23 = vpop.f32.mrf.mxu0 }
 0x348   :  { %v2705_v60 = vadd.f32 %v2704_v23, %v2652_v18  ;;  %v2719_v24 = vmax.f32 %v2703_v20, 0.0  ;;  %v2806_v18 = vrot.slane %v2793_v2, %v5396_v8 }
 0x349   :  { %v2708_v25 = vpop.f32.mrf.mxu0 }
 0x34a   :  { %v2720_v54 = vmax.f32 %v2705_v60, 0.0  ;;  %v2725_v34 = vpack.c.bf16 %v2719_v24, %v2717_v27  ;;  %v2709_v9 = vadd.f32 %v2708_v25, %v2656_v32 }
 0x34b   :  { %v2710_v28 = vpop.f32.mrf.mxu0 }
 0x34c   :  { %v2726_v63 = vpack.c.bf16 %v2720_v54, %v2718_v50  ;;  %v2711_v14 = vadd.f32 %v2710_v28, %v2658_v30  ;;  %v2721_v51 = vmax.f32 %v2709_v9, 0.0 }
 0x34d   :  { %v2712_v35 = vpop.f32.mrf.mxu0 }
 0x34e   :  { %v2713_v3 = vadd.f32 %v2712_v35, %v2660_v58  ;;  %3098 = vmatprep.mubr.bf16.mxu1 %v2726_v63  ;;  %3151 = vmatprep.mubr.bf16.mxu0 %v2726_v63  ;;  %v2722_v47 = vmax.f32 %v2711_v14, 0.0 }
 0x34f   :  { %v2714_v43 = vpop.f32.mrf.mxu0  ;;  %3099 = vmatmul.mubr.bf16.vlgmr.msra.gmra.mxu1 %v2725_v34  ;;  %3152 = vmatmul.mubr.bf16.vlgmr.msra.gmra.mxu0 %v2725_v34 }
 0x350   :  { %v2715_v55 = vadd.f32 %v2714_v43, %v2662_v39  ;;  %3985 = vmatpush3.bf16.msra.mxu0 %v4540_v31  ;;  %4023 = vmatpush3.bf16.msra.mxu1 %v4545_v1  ;;  %v2723_v44 = vmax.f32 %v2713_v3, 0.0  ;;  %v4554_v1 = vld [vmem:[%s5977_s10 + $0xa0] sm:$0xff]  }
 0x351   :  { %3986 = vmatprep.subr.bf16.mxu0 %v4541_v36  ;;  %4024 = vmatprep.subr.bf16.mxu1 %v4548_v38 }
 0x352   :  { %v2724_v49 = vmax.f32 %v2715_v55, 0.0  ;;  %v2727_v21 = vpack.c.bf16 %v2723_v44, %v2721_v51 }
 0x354   :  { %v2728_v42 = vpack.c.bf16 %v2724_v49, %v2722_v47  ;;  %3987 = vmatpush3.bf16.msra.mxu0 %v4542_v33  ;;  %4025 = vmatpush3.bf16.msra.mxu1 %v4548_v38 }
 0x355   :  { %3988 = vmatprep.subr.bf16.mxu0 %v4543_v56  ;;  %4026 = vmatprep.subr.bf16.mxu1 %v4551_v46 }
 0x356   :  { %3108 = vmatprep.mubr.bf16.mxu1 %v2728_v42  ;;  %3159 = vmatprep.mubr.bf16.mxu0 %v2728_v42 }
 0x357   :  { %3109 = vmatmul.mubr.bf16.gmra.mxu1 %v2727_v21  ;;  %3160 = vmatmul.mubr.bf16.gmra.mxu0 %v2727_v21 }
 0x358   :  { %3989 = vmatpush3.bf16.msra.mxu0 %v4544_v52  ;;  %4027 = vmatpush3.bf16.msra.mxu1 %v4551_v46 }
 0x359   :  { %3990 = vmatprep.subr.bf16.mxu0 %v4546_v45  ;;  %4028 = vmatprep.subr.bf16.mxu1 %v4554_v1 }
 0x35c   :  { %3991 = vmatpush3.bf16.msra.mxu0 %v4547_v29  ;;  %4029 = vmatpush3.bf16.msra.mxu1 %v4554_v1 }
 0x35d   :  { %3992 = vmatprep.subr.bf16.mxu0 %v4549_v53  ;;  %4030 = vmatprep.subr.bf16.mxu1 %v4557_v6 }
 0x360   :  { %3993 = vmatpush3.bf16.msra.mxu0 %v4550_v57  ;;  %4031 = vmatpush3.bf16.msra.mxu1 %v4557_v6 }
 0x361   :  { %3994 = vmatprep.subr.bf16.mxu0 %v4552_v48  ;;  %4032 = vmatprep.subr.bf16.mxu1 %v4560_v7 }
 0x364   :  { %3995 = vmatpush3.bf16.msra.mxu0 %v4553_v62  ;;  %4033 = vmatpush3.bf16.msra.mxu1 %v4560_v7 }
 0x365   :  { %3996 = vmatprep.subr.bf16.mxu0 %v4555_v4  ;;  %4034 = vmatprep.subr.bf16.mxu1 %v4561_v10 }
 0x368   :  { %3997 = vmatpush3.bf16.msra.mxu0 %v4556_v5  ;;  %4035 = vmatpush3.bf16.msra.mxu1 %v4561_v10 }
 0x369   :  { %3998 = vmatprep.subr.bf16.mxu0 %v4558_v40  ;;  %4036 = vmatprep.subr.bf16.mxu1 %v4562_v11  ;;  %v3847_v40 = vld [vmem:[%s5980_s11] ss:$0 sm:$0xff] }
 0x36c   :  { %3999 = vmatpush3.bf16.msra.mxu0 %v4559_v0  ;;  %4037 = vmatpush3.bf16.msra.mxu1 %v4562_v11 }
 0x40f   :  { %v3100_v12 = vpop.f32.mrf.mxu1  ;;  %v3972_v13 = vpop.f32.mrf.mxu0 }
 0x410   :  { %v3101_v60 = vadd.f32 %v3100_v12, %v2798_v16 }
 0x411   :  { %v3102_v41 = vpop.f32.mrf.mxu1  ;;  %v3973_v17 = vpop.f32.mrf.mxu0 }
 0x412   :  { %v3974_v19 = vadd.f32 %v3973_v17, %v3972_v13  ;;  %v3103_v37 = vadd.f32 %v3102_v41, %v2802_v15  ;;  %v3168_v63 = vmax.f32 %v3101_v60, 0.0 }
 0x413   :  { %v3104_v20 = vpop.f32.mrf.mxu1  ;;  %v3975_v22 = vpop.f32.mrf.mxu0 }
 0x414   :  { %v3105_v23 = vadd.f32 %v3104_v20, %v2798_v16  ;;  %v3154_v50 = vadd.f32 %v3974_v19, %v2806_v18  ;;  %v3169_v30 = vmax.f32 %v3103_v37, 0.0 }
 0x415   :  { %v3106_v24 = vpop.f32.mrf.mxu1  ;;  %v3976_v25 = vpop.f32.mrf.mxu0 }
 0x416   :  { %v3107_v54 = vadd.f32 %v3106_v24, %v2802_v15  ;;  %v3977_v26 = vadd.f32 %v3976_v25, %v3975_v22  ;;  %v3171_v27 = vmax.f32 %v3105_v23, 0.0  ;;  %v3170_v32 = vmax.f32 %v3154_v50, 0.0 }
 0x417   :  { %v3110_v28 = vpop.f32.mrf.mxu1  ;;  %v3978_v59 = vpop.f32.mrf.mxu0 }
 0x418   :  { %v3172_v61 = vmax.f32 %v3107_v54, 0.0  ;;  %v3157_v58 = vadd.f32 %v3977_v26, %v2806_v18  ;;  %v3180_v36 = vpack.c.bf16 %v3171_v27, %v3168_v63  ;;  %v3111_v55 = vadd.f32 %v3110_v28, %v2798_v16 }
 0x419   :  { %v3112_v31 = vpop.f32.mrf.mxu1  ;;  %v3979_v8 = vpop.f32.mrf.mxu0 }
 0x41a   :  { %v3181_v34 = vpack.c.bf16 %v3172_v61, %v3169_v30  ;;  %v3173_v35 = vmax.f32 %v3157_v58, 0.0  ;;  %v3980_v38 = vadd.f32 %v3979_v8, %v3978_v59  ;;  %v3113_v3 = vadd.f32 %v3112_v31, %v2802_v15 }
 0x41b   :  { %v3114_v39 = vpop.f32.mrf.mxu1  ;;  %v3981_v14 = vpop.f32.mrf.mxu0  ;;  %v3174_v21 = vmax.f32 %v3111_v55, 0.0 }
 0x41c   :  { %v3115_v9 = vadd.f32 %v3114_v39, %v2798_v16  ;;  %3417 = vmatprep.mubr.bf16.mxu0 %v3181_v34  ;;  %v3182_v43 = vpack.c.bf16 %v3173_v35, %v3170_v32  ;;  %v3162_v56 = vadd.f32 %v3980_v38, %v2806_v18  ;;  %v3175_v51 = vmax.f32 %v3113_v3, 0.0 }
 0x41d   :  { %v3116_v33 = vpop.f32.mrf.mxu1  ;;  %v3982_v44 = vpop.f32.mrf.mxu0  ;;  %3418 = vmatmul.mubr.bf16.vlgmr.msra.gmra.mxu0 %v3180_v36 }
 0x41e   :  { %v3117_v46 = vadd.f32 %v3116_v33, %v2802_v15  ;;  %v3983_v47 = vadd.f32 %v3982_v44, %v3981_v14  ;;  %4038 = vmatprep.mubr.bf16.mxu1 %v3182_v43  ;;  %v3177_v49 = vmax.f32 %v3115_v9, 0.0  ;;  %v3176_v45 = vmax.f32 %v3162_v56, 0.0 }
 0x420   :  { %v3178_v42 = vmax.f32 %v3117_v46, 0.0  ;;  %v3165_v52 = vadd.f32 %v3983_v47, %v2806_v18  ;;  %v3183_v57 = vpack.c.bf16 %v3177_v49, %v3174_v21 }
 0x422   :  { %v3184_v29 = vpack.c.bf16 %v3178_v42, %v3175_v51  ;;  %v3179_v53 = vmax.f32 %v3165_v52, 0.0 }
 0x424   :  { %v3185_v48 = vpack.c.bf16 %v3179_v53, %v3176_v45  ;;  %3425 = vmatprep.mubr.bf16.mxu0 %v3184_v29 }
 0x425   :  { %3426 = vmatmul.mubr.bf16.gmra.mxu0 %v3183_v57 }
 0x426   :  { %4039 = vmatmul.mubr.bf16.vlgmr.msra.gmra.mxu1 %v3185_v48 }
 0x4dd   :  { %v4000_v62 = vpop.f32.mrf.mxu0 }
 0x4df   :  { %v4001_v1 = vpop.f32.mrf.mxu0 }
 0x4e0   :  { %v4002_v5 = vadd.f32 %v4001_v1, %v4000_v62 }
 0x4e1   :  { %v4003_v4 = vpop.f32.mrf.mxu0 }
 0x4e2   :  { %v3420_v2 = vadd.f32 %v4002_v5, %v3847_v40 }
 0x4e3   :  { %v4004_v6 = vpop.f32.mrf.mxu0 }
 0x4e4   :  { %v4005_v10 = vadd.f32 %v4004_v6, %v4003_v4 }
 0x4e5   :  { %v4006_v0 = vpop.f32.mrf.mxu0 }
 0x4e6   :  { %v4040_v7 = vpop.f32.mrf.mxu1  ;;  %v3423_v19 = vadd.f32 %v4005_v10, %v3847_v40 }
 0x4e7   :  { %v4007_v11 = vpop.f32.mrf.mxu0 }
 0x4e8   :  { %v4008_v12 = vadd.f32 %v4007_v11, %v4006_v0  ;;  %v3468_v13 = vpop.f32.mrf.mxu1 }
 0x4e9   :  { %v3469_v15 = vadd.f32 %v3468_v13, %v3420_v2  ;;  %v4009_v16 = vpop.f32.mrf.mxu0 }
 0x4ea   :  { %v3428_v41 = vadd.f32 %v4008_v12, %v3847_v40  ;;  %v4041_v17 = vpop.f32.mrf.mxu1 }
 0x4eb   :  { %3483 = vst [vmem:[%s5981_s12] sm:$0xff] %v3469_v15  ;;  %v4010_v18 = vpop.f32.mrf.mxu0 }
 0x4ec   :  { %v3477_v20 = vadd.f32 %v4040_v7, %v3428_v41  ;;  %v4011_v22 = vadd.f32 %v4010_v18, %v4009_v16  ;;  %v3471_v37 = vpop.f32.mrf.mxu1 }
 0x4ed   :  { %v3472_v23 = vadd.f32 %v3471_v37, %v3423_v19 }
 0x4ee   :  { %3485 = vst [vmem:[%s5982_s13] sm:$0xff] %v3477_v20  ;;  %v3431_v60 = vadd.f32 %v4011_v22, %v3847_v40 }
 0x4ef   :  { %3484 = vst [vmem:[%s5981_s12 + $0x8] sm:$0xff] %v3472_v23 }
 0x4f0   :  { %v3480_v24 = vadd.f32 %v4041_v17, %v3431_v60 }
 0x4f2   :  { %3486 = vst [vmem:[%s5982_s13 + $0x8] sm:$0xff] %v3480_v24 }

</bundles_post_ra>
